<compile_context>
chip_gen: v7x
topology: tpu7x:2x2x1
jax: 0.10.0
libtpu: 0.0.40
codegen_flags: <defaults>
</compile_context>

<pallas_src>
import jax
import jax.numpy as jnp
from jax import lax
from jax.experimental import pallas as pl
from jax.experimental.pallas import tpu as pltpu

_CDT = jnp.bfloat16  # MXU operand dtype (f32 accumulation everywhere)


# ---------------------------- Pallas kernels ----------------------------

def _conv_pool_kernel(p_ref, w_ref, b_ref, o_ref):
    """Fused conv (im2col matmul) + bias + ReLU + 2x2 maxpool.

    p_ref: [4, M, K]  im2col patches for the 4 taps of each 2x2 pooling
                      window (M = B*OH/2*OW/2, K = KH*KW*IC), bf16.
    w_ref: [K, OC]    conv weight reshaped to (kh, kw, ic) x oc, bf16.
    b_ref: [1, OC]    bias, f32.
    o_ref: [M, OC]    pooled activation (channels-last rows), bf16.
    """
    w = w_ref[...]
    z = jnp.dot(p_ref[0], w, preferred_element_type=jnp.float32)
    z = jnp.maximum(z, jnp.dot(p_ref[1], w, preferred_element_type=jnp.float32))
    z = jnp.maximum(z, jnp.dot(p_ref[2], w, preferred_element_type=jnp.float32))
    z = jnp.maximum(z, jnp.dot(p_ref[3], w, preferred_element_type=jnp.float32))
    o_ref[...] = jnp.maximum(z + b_ref[...], 0.0).astype(o_ref.dtype)


def _fc_stack_kernel(x_ref, w1_ref, b1_ref, w2_ref, b2_ref, w3_ref, b3_ref,
                     o_ref):
    """fc1+ReLU -> fc2+ReLU -> fc3 chained in one kernel (vreg/VMEM resident)."""
    h = jnp.dot(x_ref[...], w1_ref[...], preferred_element_type=jnp.float32)
    h = jnp.maximum(h + b1_ref[...], 0.0)
    h = jnp.dot(h.astype(w2_ref.dtype), w2_ref[...],
                preferred_element_type=jnp.float32)
    h = jnp.maximum(h + b2_ref[...], 0.0)
    h = jnp.dot(h.astype(w3_ref.dtype), w3_ref[...],
                preferred_element_type=jnp.float32)
    o_ref[...] = (h + b3_ref[...]).astype(o_ref.dtype)


# ------------------------------ wrappers --------------------------------

def _conv_pool_call(p, w, b, *, m_block=512):
    """p: [4, M, K] bf16, w: [K, OC] bf16, b: [1, OC] f32 -> [M, OC] bf16."""
    _, M, K = p.shape
    OC = w.shape[1]
    out_shape = jax.ShapeDtypeStruct((M, OC), _CDT)
    if M > m_block and M % m_block == 0:
        # Large-batch path: grid over M so both v7x TensorCores get work and
        # VMEM usage stays bounded regardless of batch size.
        return pl.pallas_call(
            _conv_pool_kernel,
            grid=(M // m_block,),
            out_shape=out_shape,
            in_specs=[pl.BlockSpec((4, m_block, K), lambda i: (0, i, 0)),
                      pl.BlockSpec((K, OC), lambda i: (0, 0)),
                      pl.BlockSpec((1, OC), lambda i: (0, 0))],
            out_specs=pl.BlockSpec((m_block, OC), lambda i: (i, 0)),
            compiler_params=pltpu.CompilerParams(
                dimension_semantics=("parallel",)),
        )(p, w, b)
    # Tiny problem: one whole-array block per operand, no grid overhead.
    return pl.pallas_call(_conv_pool_kernel, out_shape=out_shape)(p, w, b)


def _pooled_patches(x, k):
    """x: [B, H, W, C] (channels-last) -> patches [4, B*(OH//2)*(OW//2), k*k*C].

    Row order (b, oh2, ow2); feature order (kh, kw, c); the leading axis holds
    the 4 taps of each 2x2 pooling window.  Requires even OH, OW (true for
    LeNet shapes).
    """
    # TODO(synk): fold this im2col into the conv kernel (grid over the k*k
    # taps with element offsets) once batch is large enough for this XLA glue
    # to dominate the trace.
    B, H, W, C = x.shape
    OH, OW = H - k + 1, W - k + 1
    OH2, OW2 = OH // 2, OW // 2
    cols = [x[:, kh:kh + OH, kw:kw + OW, :]
            for kh in range(k) for kw in range(k)]
    p = jnp.stack(cols, axis=3)                    # [B, OH, OW, k*k, C]
    p = p.reshape(B, OH2, 2, OW2, 2, k * k, C)     # split the pooling taps
    p = p.transpose(2, 4, 0, 1, 3, 5, 6)           # [2, 2, B, OH2, OW2, kk, C]
    return p.reshape(4, B * OH2 * OW2, k * k * C), OH2, OW2


def lenet5_forward(params, x):
    """x: [B, 1, 28, 28] f32 (NCHW, PyTorch convention) -> [B, 10] f32."""
    B = x.shape[0]

    # ---- one-time weight massaging (tiny tensors, fused away by XLA) ------
    # conv weights [OC, IC, KH, KW] -> [(kh, kw, ic), OC], bf16
    w1c = params["conv1_w"].transpose(2, 3, 1, 0).reshape(25 * 1, 6).astype(_CDT)
    w2c = params["conv2_w"].transpose(2, 3, 1, 0).reshape(25 * 6, 16).astype(_CDT)
    b1c = params["conv1_b"].reshape(1, 6).astype(jnp.float32)
    b2c = params["conv2_b"].reshape(1, 16).astype(jnp.float32)
    # fc1: permute input features from PyTorch's NCHW flatten order (c, h, w)
    # to the channels-last (h, w, c) order produced by the conv path.
    w1f = (params["fc1_w"].reshape(120, 16, 5, 5)
           .transpose(2, 3, 1, 0).reshape(400, 120).astype(_CDT))
    w2f = params["fc2_w"].T.astype(_CDT)
    w3f = params["fc3_w"].T.astype(_CDT)
    b1f = params["fc1_b"].reshape(1, 120).astype(jnp.float32)
    b2f = params["fc2_b"].reshape(1, 84).astype(jnp.float32)
    b3f = params["fc3_b"].reshape(1, 10).astype(jnp.float32)

    # ---- conv1 (padding=2) + ReLU + 2x2 maxpool, fused --------------------
    xp = jnp.transpose(x, (0, 2, 3, 1))                        # NCHW -> NHWC
    xp = jnp.pad(xp, ((0, 0), (2, 2), (2, 2), (0, 0))).astype(_CDT)
    p1, oh2, ow2 = _pooled_patches(xp, 5)                      # [4, B*196, 25]
    y = _conv_pool_call(p1, w1c, b1c)                          # [B*196, 6] bf16
    y = y.reshape(B, oh2, ow2, 6)                              # NHWC

    # ---- conv2 (no padding) + ReLU + 2x2 maxpool, fused --------------------
    p2, oh2, ow2 = _pooled_patches(y, 5)                       # [4, B*25, 150]
    y = _conv_pool_call(p2, w2c, b2c)                          # [B*25, 16] bf16

    # ---- fc1 -> fc2 -> fc3 in one kernel -----------------------------------
    yf = y.reshape(B, oh2 * ow2 * 16)                          # [B, 400] bf16
    out = pl.pallas_call(
        _fc_stack_kernel,
        out_shape=jax.ShapeDtypeStruct((B, 10), jnp.float32),
    )(yf, w1f, b1f, w2f, b2f, w3f, b3f)
    return out


# ------------------------- params & reference ---------------------------

def init_params(key):
    shapes = {
        "conv1_w": (6, 1, 5, 5),   "conv1_b": (6,),
        "conv2_w": (16, 6, 5, 5),  "conv2_b": (16,),
        "fc1_w": (120, 400),       "fc1_b": (120,),
        "fc2_w": (84, 120),        "fc2_b": (84,),
        "fc3_w": (10, 84),         "fc3_b": (10,),
    }
    fan_in = {"conv1_w": 25, "conv1_b": 25, "conv2_w": 150, "conv2_b": 150,
              "fc1_w": 400, "fc1_b": 400, "fc2_w": 120, "fc2_b": 120,
              "fc3_w": 84, "fc3_b": 84}
    params = {}
    names = sorted(shapes)
    keys = jax.random.split(key, len(names))
    for k_, name in zip(keys, names):
        bound = 1.0 / (fan_in[name] ** 0.5)
        params[name] = jax.random.uniform(k_, shapes[name], jnp.float32,
                                          -bound, bound)
    return params


def lenet5_reference(params, x):
    """Plain-XLA f32 reference (same math, no Pallas) used only for validation."""
    dn1 = lax.conv_dimension_numbers(x.shape, params["conv1_w"].shape,
                                     ("NCHW", "OIHW", "NCHW"))
    y = lax.conv_general_dilated(x, params["conv1_w"], (1, 1),
                                 ((2, 2), (2, 2)), dimension_numbers=dn1,
                                 precision=lax.Precision.HIGHEST)
    y = jax.nn.relu(y + params["conv1_b"][None, :, None, None])
    y = lax.reduce_window(y, -jnp.inf, lax.max, (1, 1, 2, 2), (1, 1, 2, 2), "VALID")
    dn2 = lax.conv_dimension_numbers(y.shape, params["conv2_w"].shape,
                                     ("NCHW", "OIHW", "NCHW"))
    y = lax.conv_general_dilated(y, params["conv2_w"], (1, 1),
                                 ((0, 0), (0, 0)), dimension_numbers=dn2,
                                 precision=lax.Precision.HIGHEST)
    y = jax.nn.relu(y + params["conv2_b"][None, :, None, None])
    y = lax.reduce_window(y, -jnp.inf, lax.max, (1, 1, 2, 2), (1, 1, 2, 2), "VALID")
    y = y.reshape(y.shape[0], -1)
    hp = lax.Precision.HIGHEST
    y = jax.nn.relu(jnp.dot(y, params["fc1_w"].T, precision=hp) + params["fc1_b"])
    y = jax.nn.relu(jnp.dot(y, params["fc2_w"].T, precision=hp) + params["fc2_b"])
    return jnp.dot(y, params["fc3_w"].T, precision=hp) + params["fc3_b"]


if __name__ == "__main__":
    key = jax.random.PRNGKey(0)
    pkey, xkey = jax.random.split(key)
    params = init_params(pkey)
    x = jax.random.normal(xkey, (2, 1, 28, 28), dtype=jnp.float32)

    out = jax.jit(lenet5_forward)(params, x)
    out = jax.block_until_ready(out)

    ref = lenet5_reference(params, x)
    assert out.shape == (2, 10), out.shape
    assert jnp.allclose(out, ref, atol=5e-2, rtol=5e-2), (
        "mismatch vs XLA reference: max abs err = "
        f"{float(jnp.max(jnp.abs(out - ref)))}")
    print("KERNEL_OK")
</pallas_src>

<mosaic_0001>
module attributes {stable_mosaic.version = 11 : i64} {
  func.func @_conv_pool_kernel(%arg0: memref<4x392x25xbf16, #tpu.memory_space<vmem>>, %arg1: memref<25x6xbf16, #tpu.memory_space<vmem>>, %arg2: memref<1x6xf32, #tpu.memory_space<vmem>>, %arg3: memref<392x6xbf16, #tpu.memory_space<vmem>>) attributes {dimension_semantics = [], scalar_prefetch = 0 : i64, scratch_operands = 0 : i64, tpu.core_type = #tpu.core_type<tc>} {
    %c0 = arith.constant 0 : index
    %c0_0 = arith.constant 0 : index
    %0 = vector.load %arg1[%c0, %c0_0] : memref<25x6xbf16, #tpu.memory_space<vmem>>, vector<25x6xbf16>
    %c0_1 = arith.constant 0 : index
    %c0_2 = arith.constant 0 : index
    %c0_3 = arith.constant 0 : index
    %1 = vector.load %arg0[%c0_1, %c0_2, %c0_3] : memref<4x392x25xbf16, #tpu.memory_space<vmem>>, vector<1x392x25xbf16>
    %2 = vector.shape_cast %1 : vector<1x392x25xbf16> to vector<392x25xbf16>
    %cst = arith.constant dense<0.000000e+00> : vector<392x6xf32>
    %3 = tpu.matmul %2, %0, %cst {dimension_numbers = #tpu.dot_dimension_numbers<[1], [0], [0], [1], [0, 0, 1, 1], [], []>} : vector<392x25xbf16>, vector<25x6xbf16>, vector<392x6xf32> -> vector<392x6xf32>
    %c1 = arith.constant 1 : index
    %c0_4 = arith.constant 0 : index
    %c0_5 = arith.constant 0 : index
    %4 = vector.load %arg0[%c1, %c0_4, %c0_5] : memref<4x392x25xbf16, #tpu.memory_space<vmem>>, vector<1x392x25xbf16>
    %5 = vector.shape_cast %4 : vector<1x392x25xbf16> to vector<392x25xbf16>
    %cst_6 = arith.constant dense<0.000000e+00> : vector<392x6xf32>
    %6 = tpu.matmul %5, %0, %cst_6 {dimension_numbers = #tpu.dot_dimension_numbers<[1], [0], [0], [1], [0, 0, 1, 1], [], []>} : vector<392x25xbf16>, vector<25x6xbf16>, vector<392x6xf32> -> vector<392x6xf32>
    %7 = arith.maximumf %3, %6 : vector<392x6xf32>
    %c2 = arith.constant 2 : index
    %c0_7 = arith.constant 0 : index
    %c0_8 = arith.constant 0 : index
    %8 = vector.load %arg0[%c2, %c0_7, %c0_8] : memref<4x392x25xbf16, #tpu.memory_space<vmem>>, vector<1x392x25xbf16>
    %9 = vector.shape_cast %8 : vector<1x392x25xbf16> to vector<392x25xbf16>
    %cst_9 = arith.constant dense<0.000000e+00> : vector<392x6xf32>
    %10 = tpu.matmul %9, %0, %cst_9 {dimension_numbers = #tpu.dot_dimension_numbers<[1], [0], [0], [1], [0, 0, 1, 1], [], []>} : vector<392x25xbf16>, vector<25x6xbf16>, vector<392x6xf32> -> vector<392x6xf32>
    %11 = arith.maximumf %7, %10 : vector<392x6xf32>
    %c3 = arith.constant 3 : index
    %c0_10 = arith.constant 0 : index
    %c0_11 = arith.constant 0 : index
    %12 = vector.load %arg0[%c3, %c0_10, %c0_11] : memref<4x392x25xbf16, #tpu.memory_space<vmem>>, vector<1x392x25xbf16>
    %13 = vector.shape_cast %12 : vector<1x392x25xbf16> to vector<392x25xbf16>
    %cst_12 = arith.constant dense<0.000000e+00> : vector<392x6xf32>
    %14 = tpu.matmul %13, %0, %cst_12 {dimension_numbers = #tpu.dot_dimension_numbers<[1], [0], [0], [1], [0, 0, 1, 1], [], []>} : vector<392x25xbf16>, vector<25x6xbf16>, vector<392x6xf32> -> vector<392x6xf32>
    %15 = arith.maximumf %11, %14 : vector<392x6xf32>
    %c0_13 = arith.constant 0 : index
    %c0_14 = arith.constant 0 : index
    %16 = vector.load %arg2[%c0_13, %c0_14] : memref<1x6xf32, #tpu.memory_space<vmem>>, vector<1x6xf32>
    %17 = vector.broadcast %16 : vector<1x6xf32> to vector<392x6xf32>
    %18 = arith.addf %15, %17 : vector<392x6xf32>
    %cst_15 = arith.constant 0.000000e+00 : f32
    %19 = vector.broadcast %cst_15 : f32 to vector<392x6xf32>
    %20 = arith.maximumf %18, %19 : vector<392x6xf32>
    %21 = arith.truncf %20 : vector<392x6xf32> to vector<392x6xbf16>
    %c0_16 = arith.constant 0 : index
    %c0_17 = arith.constant 0 : index
    %22 = vector.load %arg3[%c0_16, %c0_17] : memref<392x6xbf16, #tpu.memory_space<vmem>>, vector<392x6xbf16>
    tpu.vector_store %arg3[%c0_16, %c0_17], %21 {strides = array<i32>} : memref<392x6xbf16, #tpu.memory_space<vmem>>, vector<392x6xbf16>,
    return
  }
}

module attributes {stable_mosaic.version = 11 : i64} {
  func.func @_conv_pool_kernel(%arg0: memref<4x50x150xbf16, #tpu.memory_space<vmem>>, %arg1: memref<150x16xbf16, #tpu.memory_space<vmem>>, %arg2: memref<1x16xf32, #tpu.memory_space<vmem>>, %arg3: memref<50x16xbf16, #tpu.memory_space<vmem>>) attributes {dimension_semantics = [], scalar_prefetch = 0 : i64, scratch_operands = 0 : i64, tpu.core_type = #tpu.core_type<tc>} {
    %c0 = arith.constant 0 : index
    %c0_0 = arith.constant 0 : index
    %0 = vector.load %arg1[%c0, %c0_0] : memref<150x16xbf16, #tpu.memory_space<vmem>>, vector<150x16xbf16>
    %c0_1 = arith.constant 0 : index
    %c0_2 = arith.constant 0 : index
    %c0_3 = arith.constant 0 : index
    %1 = vector.load %arg0[%c0_1, %c0_2, %c0_3] : memref<4x50x150xbf16, #tpu.memory_space<vmem>>, vector<1x50x150xbf16>
    %2 = vector.shape_cast %1 : vector<1x50x150xbf16> to vector<50x150xbf16>
    %cst = arith.constant dense<0.000000e+00> : vector<50x16xf32>
    %3 = tpu.matmul %2, %0, %cst {dimension_numbers = #tpu.dot_dimension_numbers<[1], [0], [0], [1], [0, 0, 1, 1], [], []>} : vector<50x150xbf16>, vector<150x16xbf16>, vector<50x16xf32> -> vector<50x16xf32>
    %c1 = arith.constant 1 : index
    %c0_4 = arith.constant 0 : index
    %c0_5 = arith.constant 0 : index
    %4 = vector.load %arg0[%c1, %c0_4, %c0_5] : memref<4x50x150xbf16, #tpu.memory_space<vmem>>, vector<1x50x150xbf16>
    %5 = vector.shape_cast %4 : vector<1x50x150xbf16> to vector<50x150xbf16>
    %cst_6 = arith.constant dense<0.000000e+00> : vector<50x16xf32>
    %6 = tpu.matmul %5, %0, %cst_6 {dimension_numbers = #tpu.dot_dimension_numbers<[1], [0], [0], [1], [0, 0, 1, 1], [], []>} : vector<50x150xbf16>, vector<150x16xbf16>, vector<50x16xf32> -> vector<50x16xf32>
    %7 = arith.maximumf %3, %6 : vector<50x16xf32>
    %c2 = arith.constant 2 : index
    %c0_7 = arith.constant 0 : index
    %c0_8 = arith.constant 0 : index
    %8 = vector.load %arg0[%c2, %c0_7, %c0_8] : memref<4x50x150xbf16, #tpu.memory_space<vmem>>, vector<1x50x150xbf16>
    %9 = vector.shape_cast %8 : vector<1x50x150xbf16> to vector<50x150xbf16>
    %cst_9 = arith.constant dense<0.000000e+00> : vector<50x16xf32>
    %10 = tpu.matmul %9, %0, %cst_9 {dimension_numbers = #tpu.dot_dimension_numbers<[1], [0], [0], [1], [0, 0, 1, 1], [], []>} : vector<50x150xbf16>, vector<150x16xbf16>, vector<50x16xf32> -> vector<50x16xf32>
    %11 = arith.maximumf %7, %10 : vector<50x16xf32>
    %c3 = arith.constant 3 : index
    %c0_10 = arith.constant 0 : index
    %c0_11 = arith.constant 0 : index
    %12 = vector.load %arg0[%c3, %c0_10, %c0_11] : memref<4x50x150xbf16, #tpu.memory_space<vmem>>, vector<1x50x150xbf16>
    %13 = vector.shape_cast %12 : vector<1x50x150xbf16> to vector<50x150xbf16>
    %cst_12 = arith.constant dense<0.000000e+00> : vector<50x16xf32>
    %14 = tpu.matmul %13, %0, %cst_12 {dimension_numbers = #tpu.dot_dimension_numbers<[1], [0], [0], [1], [0, 0, 1, 1], [], []>} : vector<50x150xbf16>, vector<150x16xbf16>, vector<50x16xf32> -> vector<50x16xf32>
    %15 = arith.maximumf %11, %14 : vector<50x16xf32>
    %c0_13 = arith.constant 0 : index
    %c0_14 = arith.constant 0 : index
    %16 = vector.load %arg2[%c0_13, %c0_14] : memref<1x16xf32, #tpu.memory_space<vmem>>, vector<1x16xf32>
    %17 = vector.broadcast %16 : vector<1x16xf32> to vector<50x16xf32>
    %18 = arith.addf %15, %17 : vector<50x16xf32>
    %cst_15 = arith.constant 0.000000e+00 : f32
    %19 = vector.broadcast %cst_15 : f32 to vector<50x16xf32>
    %20 = arith.maximumf %18, %19 : vector<50x16xf32>
    %21 = arith.truncf %20 : vector<50x16xf32> to vector<50x16xbf16>
    %c0_16 = arith.constant 0 : index
    %c0_17 = arith.constant 0 : index
    %22 = vector.load %arg3[%c0_16, %c0_17] : memref<50x16xbf16, #tpu.memory_space<vmem>>, vector<50x16xbf16>
    tpu.vector_store %arg3[%c0_16, %c0_17], %21 {strides = array<i32>} : memref<50x16xbf16, #tpu.memory_space<vmem>>, vector<50x16xbf16>,
    return
  }
}

module attributes {stable_mosaic.version = 11 : i64} {
  func.func @_fc_stack_kernel(%arg0: memref<2x400xbf16, #tpu.memory_space<vmem>>, %arg1: memref<400x120xbf16, #tpu.memory_space<vmem>>, %arg2: memref<1x120xf32, #tpu.memory_space<vmem>>, %arg3: memref<120x84xbf16, #tpu.memory_space<vmem>>, %arg4: memref<1x84xf32, #tpu.memory_space<vmem>>, %arg5: memref<84x10xbf16, #tpu.memory_space<vmem>>, %arg6: memref<1x10xf32, #tpu.memory_space<vmem>>, %arg7: memref<2x10xf32, #tpu.memory_space<vmem>>) attributes {dimension_semantics = [], scalar_prefetch = 0 : i64, scratch_operands = 0 : i64, tpu.core_type = #tpu.core_type<tc>} {
    %c0 = arith.constant 0 : index
    %c0_0 = arith.constant 0 : index
    %0 = vector.load %arg0[%c0, %c0_0] : memref<2x400xbf16, #tpu.memory_space<vmem>>, vector<2x400xbf16>
    %c0_1 = arith.constant 0 : index
    %c0_2 = arith.constant 0 : index
    %1 = vector.load %arg1[%c0_1, %c0_2] : memref<400x120xbf16, #tpu.memory_space<vmem>>, vector<400x120xbf16>
    %cst = arith.constant dense<0.000000e+00> : vector<2x120xf32>
    %2 = tpu.matmul %0, %1, %cst {dimension_numbers = #tpu.dot_dimension_numbers<[1], [0], [0], [1], [0, 0, 1, 1], [], []>} : vector<2x400xbf16>, vector<400x120xbf16>, vector<2x120xf32> -> vector<2x120xf32>
    %c0_3 = arith.constant 0 : index
    %c0_4 = arith.constant 0 : index
    %3 = vector.load %arg2[%c0_3, %c0_4] : memref<1x120xf32, #tpu.memory_space<vmem>>, vector<1x120xf32>
    %4 = vector.broadcast %3 : vector<1x120xf32> to vector<2x120xf32>
    %5 = arith.addf %2, %4 : vector<2x120xf32>
    %cst_5 = arith.constant 0.000000e+00 : f32
    %6 = vector.broadcast %cst_5 : f32 to vector<2x120xf32>
    %7 = arith.maximumf %5, %6 : vector<2x120xf32>
    %8 = arith.truncf %7 : vector<2x120xf32> to vector<2x120xbf16>
    %c0_6 = arith.constant 0 : index
    %c0_7 = arith.constant 0 : index
    %9 = vector.load %arg3[%c0_6, %c0_7] : memref<120x84xbf16, #tpu.memory_space<vmem>>, vector<120x84xbf16>
    %cst_8 = arith.constant dense<0.000000e+00> : vector<2x84xf32>
    %10 = tpu.matmul %8, %9, %cst_8 {dimension_numbers = #tpu.dot_dimension_numbers<[1], [0], [0], [1], [0, 0, 1, 1], [], []>} : vector<2x120xbf16>, vector<120x84xbf16>, vector<2x84xf32> -> vector<2x84xf32>
    %c0_9 = arith.constant 0 : index
    %c0_10 = arith.constant 0 : index
    %11 = vector.load %arg4[%c0_9, %c0_10] : memref<1x84xf32, #tpu.memory_space<vmem>>, vector<1x84xf32>
    %12 = vector.broadcast %11 : vector<1x84xf32> to vector<2x84xf32>
    %13 = arith.addf %10, %12 : vector<2x84xf32>
    %cst_11 = arith.constant 0.000000e+00 : f32
    %14 = vector.broadcast %cst_11 : f32 to vector<2x84xf32>
    %15 = arith.maximumf %13, %14 : vector<2x84xf32>
    %16 = arith.truncf %15 : vector<2x84xf32> to vector<2x84xbf16>
    %c0_12 = arith.constant 0 : index
    %c0_13 = arith.constant 0 : index
    %17 = vector.load %arg5[%c0_12, %c0_13] : memref<84x10xbf16, #tpu.memory_space<vmem>>, vector<84x10xbf16>
    %cst_14 = arith.constant dense<0.000000e+00> : vector<2x10xf32>
    %18 = tpu.matmul %16, %17, %cst_14 {dimension_numbers = #tpu.dot_dimension_numbers<[1], [0], [0], [1], [0, 0, 1, 1], [], []>} : vector<2x84xbf16>, vector<84x10xbf16>, vector<2x10xf32> -> vector<2x10xf32>
    %c0_15 = arith.constant 0 : index
    %c0_16 = arith.constant 0 : index
    %19 = vector.load %arg6[%c0_15, %c0_16] : memref<1x10xf32, #tpu.memory_space<vmem>>, vector<1x10xf32>
    %20 = vector.broadcast %19 : vector<1x10xf32> to vector<2x10xf32>
    %21 = arith.addf %18, %20 : vector<2x10xf32>
    %c0_17 = arith.constant 0 : index
    %c0_18 = arith.constant 0 : index
    %22 = vector.load %arg7[%c0_17, %c0_18] : memref<2x10xf32, #tpu.memory_space<vmem>>, vector<2x10xf32>
    tpu.vector_store %arg7[%c0_17, %c0_18], %21 {strides = array<i32>} : memref<2x10xf32, #tpu.memory_space<vmem>>, vector<2x10xf32>,
    return
  }
}

</mosaic_0001>

<bundles_post_ra>
// kernel: lenet5_forward.3
= control target key start
LH: loop header
LB: loop body
LE: loop exit
PB: predicated region body
PF: predicated region fallthrough
CT: control target
= control target key end

     0   :  { %vm278_vm0 = vcmask 1043456   ;;  %vm279_vm1 = vcmask 1044480   ;;  %v4869_v0 = vmov 0.0   ;;  %v3538_v2 = vmov 65535   ;;  %s4865_s1 = inlined_call_operand.vmem [shape: bf16[25,6], index: 1, kind: input, shape index: {}]   ;;  %s4866_s0 = inlined_call_operand.vmem [shape: bf16[4,392,25], index: 0, kind: input, shape index: {}]   ;;  %s4867_s2 = inlined_call_operand.vmem [shape: f32[1,6], index: 2, kind: input, shape index: {}]   ;;  %s4868_s3 = inlined_call_operand.vmem [shape: bf16[392,6], index: 3, kind: output, shape index: {}]  }
   0x1   :  { %3016 = vmatprep.subr.bf16.mxu0 %v4869_v0  ;;  %3120 = vmatprep.subr.bf16.mxu1 %v4869_v0  ;;  %v3435_v1 = vld [vmem:[%s4865_s1] sm:$0xff]   ;;  %v280_v3 = vsel %vm278_vm0, 4294967295, %v3538_v2  ;;  %v3436_v4 = vld [vmem:[%s4865_s1 + $0x8] sm:$0x1f]   ;;  %vm3539_vm2 = vmmov 0   ;;  %vm202_vm3 = vcmask 203776  }
   0x2   :  { %3017 = vmatpush3.bf16.msra.mxu0 %v3435_v1  ;;  %3121 = vmatpush3.bf16.msra.mxu1 %v3435_v1  ;;  %v281_v5 = vsel %vm279_vm1, %v280_v3, 0  ;;  %v3437_v7 = vld [vmem:[%s4866_s0] sm:$0xff]   ;;  %v3439_v9 = vld [vmem:[%s4866_s0 + $0x8] sm:$0xff]   ;;  %v3441_v11 = vld [vmem:[%s4866_s0 + $0x10] sm:$0xff]   ;;  %vm2406_vm4 = vcmask 44032  }
   0x3   :  { %3018 = vmatprep.subr.bf16.mxu0 %v4869_v0  ;;  %3122 = vmatprep.subr.bf16.mxu1 %v4869_v0  ;;  %v283_v6 = vand.u32 %v3436_v4, %v281_v5  ;;  %v3438_v8 = vld [vmem:[%s4866_s0 + $0xc4] sm:$0xff]   ;;  %v3440_v10 = vld [vmem:[%s4866_s0 + $0xcc] sm:$0xff]   ;;  %v3442_v12 = vld [vmem:[%s4866_s0 + $0xd4] sm:$0xff]  }
   0x4   :  { %3020 = vmatprep.mubr.msk.bf16.mxu0 %vm3539_vm2, %v4869_v0  ;;  %3124 = vmatprep.mubr.msk.bf16.mxu1 %vm3539_vm2, %v4869_v0  ;;  %v3443_v13 = vld [vmem:[%s4866_s0 + $0x18] sm:$0xff]   ;;  %v3445_v15 = vld [vmem:[%s4866_s0 + $0x20] sm:$0xff]   ;;  %v3447_v17 = vld [vmem:[%s4866_s0 + $0x28] sm:$0xff]  }
   0x5   :  { %v3444_v14 = vld [vmem:[%s4866_s0 + $0xdc] sm:$0xff]   ;;  %v3446_v16 = vld [vmem:[%s4866_s0 + $0xe4] sm:$0xff]   ;;  %v3448_v18 = vld [vmem:[%s4866_s0 + $0xec] sm:$0xff]  }
   0x6   :  { %3019 = vmatpush3.bf16.msra.mxu0 %v283_v6  ;;  %3123 = vmatpush3.bf16.msra.mxu1 %v283_v6  ;;  %v3449_v19 = vld [vmem:[%s4866_s0 + $0x30] sm:$0xff]   ;;  %v3451_v21 = vld [vmem:[%s4866_s0 + $0x38] sm:$0xff]   ;;  %v3453_v23 = vld [vmem:[%s4866_s0 + $0x40] sm:$0xff]  }
   0x7   :  { %3224 = vmatprep.subr.bf16.mxu0 %v4869_v0  ;;  %3328 = vmatprep.subr.bf16.mxu1 %v4869_v0  ;;  %v3450_v20 = vld [vmem:[%s4866_s0 + $0xf4] sm:$0xff]   ;;  %v3452_v22 = vld [vmem:[%s4866_s0 + $0xfc] sm:$0xff]   ;;  %v3454_v24 = vld [vmem:[%s4866_s0 + $0x104] sm:$0xff]  }
   0x8   :  { %v3455_v25 = vld [vmem:[%s4866_s0 + $0x48] sm:$0xff]   ;;  %v3457_v27 = vld [vmem:[%s4866_s0 + $0x50] sm:$0xff]   ;;  %v3459_v29 = vld [vmem:[%s4866_s0 + $0x58] sm:$0xff]  }
   0x9   :  { %3021 = vmatmul.mubr.msk.bf16.vlgmr.msra.gmra.mrb[0].mxu0 %vm202_vm3, %v3437_v7  ;;  %3125 = vmatmul.mubr.msk.bf16.vlgmr.msra.gmra.mrb[0].mxu1 %vm202_vm3, %v3438_v8  ;;  %v3456_v26 = vld [vmem:[%s4866_s0 + $0x10c] sm:$0xff]   ;;  %v3458_v28 = vld [vmem:[%s4866_s0 + $0x114] sm:$0xff]   ;;  %v3460_v30 = vld [vmem:[%s4866_s0 + $0x11c] sm:$0xff]  }
   0xa   :  { %3225 = vmatpush3.bf16.msra.mxu0 %v3435_v1  ;;  %3329 = vmatpush3.bf16.msra.mxu1 %v3435_v1  ;;  %v3461_v31 = vld [vmem:[%s4866_s0 + $0x60] sm:$0xff]   ;;  %v3463_v33 = vld [vmem:[%s4866_s0 + $0x68] sm:$0xff]   ;;  %v3465_v35 = vld [vmem:[%s4866_s0 + $0x70] sm:$0xff]  }
   0xb   :  { %3024 = vmatprep.mubr.msk.bf16.mxu0 %vm3539_vm2, %v4869_v0  ;;  %3128 = vmatprep.mubr.msk.bf16.mxu1 %vm3539_vm2, %v4869_v0  ;;  %v3462_v32 = vld [vmem:[%s4866_s0 + $0x124] sm:$0xff]   ;;  %v3464_v34 = vld [vmem:[%s4866_s0 + $0x12c] sm:$0xff]   ;;  %v3466_v36 = vld [vmem:[%s4866_s0 + $0x134] sm:$0xff]  }
   0xc   :  { %3226 = vmatprep.subr.bf16.mxu0 %v4869_v0  ;;  %3330 = vmatprep.subr.bf16.mxu1 %v4869_v0  ;;  %v3467_v37 = vld [vmem:[%s4866_s0 + $0x78] sm:$0xff]   ;;  %v3469_v39 = vld [vmem:[%s4866_s0 + $0x80] sm:$0xff]   ;;  %v3471_v41 = vld [vmem:[%s4866_s0 + $0x88] sm:$0xff]  }
   0xd   :  { %v3468_v38 = vld [vmem:[%s4866_s0 + $0x13c] sm:$0xff]   ;;  %v3470_v40 = vld [vmem:[%s4866_s0 + $0x144] sm:$0xff]   ;;  %v3472_v42 = vld [vmem:[%s4866_s0 + $0x14c] sm:$0xff]  }
   0xe   :  { %3227 = vmatpush3.bf16.msra.mxu0 %v283_v6  ;;  %3331 = vmatpush3.bf16.msra.mxu1 %v283_v6  ;;  %v3473_v43 = vld [vmem:[%s4866_s0 + $0x90] sm:$0xff]   ;;  %v3475_v45 = vld [vmem:[%s4866_s0 + $0x98] sm:$0xff]   ;;  %v3477_v47 = vld [vmem:[%s4866_s0 + $0xa0] sm:$0xff]  }
   0xf   :  { %v3474_v44 = vld [vmem:[%s4866_s0 + $0x154] sm:$0xff]   ;;  %v3476_v46 = vld [vmem:[%s4866_s0 + $0x15c] sm:$0xff]   ;;  %v3478_v48 = vld [vmem:[%s4866_s0 + $0x164] sm:$0xff]  }
  0x10   :  { %v3479_v49 = vld [vmem:[%s4866_s0 + $0xa8] sm:$0xff]   ;;  %v3481_v51 = vld [vmem:[%s4866_s0 + $0xb0] sm:$0xff]   ;;  %v3483_v53 = vld [vmem:[%s4866_s0 + $0xb8] sm:$0xff]  }
  0x11   :  { %3025 = vmatmul.mubr.msk.bf16.gmra.mrb[4].mxu0 %vm202_vm3, %v3439_v9  ;;  %3129 = vmatmul.mubr.msk.bf16.gmra.mrb[4].mxu1 %vm202_vm3, %v3440_v10  ;;  %v3480_v50 = vld [vmem:[%s4866_s0 + $0x16c] sm:$0xff]   ;;  %v3482_v52 = vld [vmem:[%s4866_s0 + $0x174] sm:$0xff]   ;;  %v3484_v54 = vld [vmem:[%s4866_s0 + $0x17c] sm:$0xff]  }
  0x12   :  { %3028 = vmatprep.mubr.msk.bf16.mxu0 %vm3539_vm2, %v4869_v0  ;;  %3132 = vmatprep.mubr.msk.bf16.mxu1 %vm3539_vm2, %v4869_v0  ;;  %v3485_v55 = vld [vmem:[%s4866_s0 + $0xc0] ss:$0 sps:$4 sm:$0xff]   ;;  %v3486_v56 = vld [vmem:[%s4866_s0 + $0x184] ss:$0 sps:$4 sm:$0xff]   ;;  %v3487_v57 = vld [vmem:[%s4866_s0 + $0x188] sm:$0xff]  }
  0x13   :  { %v3488_v58 = vld [vmem:[%s4866_s0 + $0x24c] sm:$0xff]   ;;  %v3490_v60 = vld [vmem:[%s4866_s0 + $0x254] sm:$0xff]   ;;  %v3492_v4 = vld [vmem:[%s4866_s0 + $0x25c] sm:$0xff]  }
  0x14   :  { %v3489_v59 = vld [vmem:[%s4866_s0 + $0x190] sm:$0xff]   ;;  %v3491_v3 = vld [vmem:[%s4866_s0 + $0x198] sm:$0xff]  }
  0x19   :  { %3029 = vmatmul.mubr.msk.bf16.gmra.mrb[8].mxu0 %vm202_vm3, %v3441_v11  ;;  %3133 = vmatmul.mubr.msk.bf16.gmra.mrb[8].mxu1 %vm202_vm3, %v3442_v12 }
  0x1a   :  { %3032 = vmatprep.mubr.msk.bf16.mxu0 %vm3539_vm2, %v4869_v0  ;;  %3136 = vmatprep.mubr.msk.bf16.mxu1 %vm3539_vm2, %v4869_v0 }
  0x21   :  { %3033 = vmatmul.mubr.msk.bf16.gmra.mrb[12].mxu0 %vm202_vm3, %v3443_v13  ;;  %3137 = vmatmul.mubr.msk.bf16.gmra.mrb[12].mxu1 %vm202_vm3, %v3444_v14 }
  0x22   :  { %3036 = vmatprep.mubr.msk.bf16.mxu0 %vm3539_vm2, %v4869_v0  ;;  %3140 = vmatprep.mubr.msk.bf16.mxu1 %vm3539_vm2, %v4869_v0 }
  0x29   :  { %3037 = vmatmul.mubr.msk.bf16.gmra.mrb[16].mxu0 %vm202_vm3, %v3445_v15  ;;  %3141 = vmatmul.mubr.msk.bf16.gmra.mrb[16].mxu1 %vm202_vm3, %v3446_v16  ;;  %v3493_v15 = vld [vmem:[%s4866_s0 + $0x1a0] sm:$0xff]  }
  0x2a   :  { %3040 = vmatprep.mubr.msk.bf16.mxu0 %vm3539_vm2, %v4869_v0  ;;  %3144 = vmatprep.mubr.msk.bf16.mxu1 %vm3539_vm2, %v4869_v0  ;;  %v3494_v16 = vld [vmem:[%s4866_s0 + $0x264] sm:$0xff]  }
  0x31   :  { %3041 = vmatmul.mubr.msk.bf16.gmra.mrb[20].mxu0 %vm202_vm3, %v3447_v17  ;;  %3145 = vmatmul.mubr.msk.bf16.gmra.mrb[20].mxu1 %vm202_vm3, %v3448_v18 }
  0x32   :  { %3044 = vmatprep.mubr.msk.bf16.mxu0 %vm3539_vm2, %v4869_v0  ;;  %3148 = vmatprep.mubr.msk.bf16.mxu1 %vm3539_vm2, %v4869_v0 }
  0x39   :  { %3045 = vmatmul.mubr.msk.bf16.gmra.mrb[24].mxu0 %vm202_vm3, %v3449_v19  ;;  %3149 = vmatmul.mubr.msk.bf16.gmra.mrb[24].mxu1 %vm202_vm3, %v3450_v20 }
  0x3a   :  { %3048 = vmatprep.mubr.msk.bf16.mxu0 %vm3539_vm2, %v4869_v0  ;;  %3152 = vmatprep.mubr.msk.bf16.mxu1 %vm3539_vm2, %v4869_v0 }
  0x41   :  { %3049 = vmatmul.mubr.msk.bf16.gmra.mrb[28].mxu0 %vm202_vm3, %v3451_v21  ;;  %3153 = vmatmul.mubr.msk.bf16.gmra.mrb[28].mxu1 %vm202_vm3, %v3452_v22 }
  0x42   :  { %3052 = vmatprep.mubr.msk.bf16.mxu0 %vm3539_vm2, %v4869_v0  ;;  %3156 = vmatprep.mubr.msk.bf16.mxu1 %vm3539_vm2, %v4869_v0 }
  0x49   :  { %3053 = vmatmul.mubr.msk.bf16.gmra.mrb[32].mxu0 %vm202_vm3, %v3453_v23  ;;  %3157 = vmatmul.mubr.msk.bf16.gmra.mrb[32].mxu1 %vm202_vm3, %v3454_v24 }
  0x4a   :  { %3056 = vmatprep.mubr.msk.bf16.mxu0 %vm3539_vm2, %v4869_v0  ;;  %3160 = vmatprep.mubr.msk.bf16.mxu1 %vm3539_vm2, %v4869_v0 }
  0x51   :  { %3057 = vmatmul.mubr.msk.bf16.gmra.mrb[36].mxu0 %vm202_vm3, %v3455_v25  ;;  %3161 = vmatmul.mubr.msk.bf16.gmra.mrb[36].mxu1 %vm202_vm3, %v3456_v26 }
  0x52   :  { %3060 = vmatprep.mubr.msk.bf16.mxu0 %vm3539_vm2, %v4869_v0  ;;  %3164 = vmatprep.mubr.msk.bf16.mxu1 %vm3539_vm2, %v4869_v0 }
  0x59   :  { %3061 = vmatmul.mubr.msk.bf16.gmra.mrb[40].mxu0 %vm202_vm3, %v3457_v27  ;;  %3165 = vmatmul.mubr.msk.bf16.gmra.mrb[40].mxu1 %vm202_vm3, %v3458_v28  ;;  %v3495_v27 = vld [vmem:[%s4866_s0 + $0x1a8] sm:$0xff]  }
  0x5a   :  { %3064 = vmatprep.mubr.msk.bf16.mxu0 %vm3539_vm2, %v4869_v0  ;;  %3168 = vmatprep.mubr.msk.bf16.mxu1 %vm3539_vm2, %v4869_v0  ;;  %v3496_v28 = vld [vmem:[%s4866_s0 + $0x26c] sm:$0xff]  }
  0x61   :  { %3065 = vmatmul.mubr.msk.bf16.gmra.mrb[44].mxu0 %vm202_vm3, %v3459_v29  ;;  %3169 = vmatmul.mubr.msk.bf16.gmra.mrb[44].mxu1 %vm202_vm3, %v3460_v30 }
  0x62   :  { %3068 = vmatprep.mubr.msk.bf16.mxu0 %vm3539_vm2, %v4869_v0  ;;  %3172 = vmatprep.mubr.msk.bf16.mxu1 %vm3539_vm2, %v4869_v0 }
  0x69   :  { %3069 = vmatmul.mubr.msk.bf16.gmra.mrb[48].mxu0 %vm202_vm3, %v3461_v31  ;;  %3173 = vmatmul.mubr.msk.bf16.gmra.mrb[48].mxu1 %vm202_vm3, %v3462_v32 }
  0x6a   :  { %3072 = vmatprep.mubr.msk.bf16.mxu0 %vm3539_vm2, %v4869_v0  ;;  %3176 = vmatprep.mubr.msk.bf16.mxu1 %vm3539_vm2, %v4869_v0 }
  0x71   :  { %3073 = vmatmul.mubr.msk.bf16.gmra.mrb[52].mxu0 %vm202_vm3, %v3463_v33  ;;  %3177 = vmatmul.mubr.msk.bf16.gmra.mrb[52].mxu1 %vm202_vm3, %v3464_v34 }
  0x72   :  { %3076 = vmatprep.mubr.msk.bf16.mxu0 %vm3539_vm2, %v4869_v0  ;;  %3180 = vmatprep.mubr.msk.bf16.mxu1 %vm3539_vm2, %v4869_v0 }
  0x79   :  { %3077 = vmatmul.mubr.msk.bf16.gmra.mrb[56].mxu0 %vm202_vm3, %v3465_v35  ;;  %3181 = vmatmul.mubr.msk.bf16.gmra.mrb[56].mxu1 %vm202_vm3, %v3466_v36 }
  0x7a   :  { %3080 = vmatprep.mubr.msk.bf16.mxu0 %vm3539_vm2, %v4869_v0  ;;  %3184 = vmatprep.mubr.msk.bf16.mxu1 %vm3539_vm2, %v4869_v0 }
  0x81   :  { %3081 = vmatmul.mubr.msk.bf16.gmra.mrb[60].mxu0 %vm202_vm3, %v3467_v37  ;;  %3185 = vmatmul.mubr.msk.bf16.gmra.mrb[60].mxu1 %vm202_vm3, %v3468_v38 }
  0x82   :  { %3084 = vmatprep.mubr.msk.bf16.mxu0 %vm3539_vm2, %v4869_v0  ;;  %3188 = vmatprep.mubr.msk.bf16.mxu1 %vm3539_vm2, %v4869_v0 }
  0x89   :  { %3085 = vmatmul.mubr.msk.bf16.gmra.mrb[64].mxu0 %vm202_vm3, %v3469_v39  ;;  %3189 = vmatmul.mubr.msk.bf16.gmra.mrb[64].mxu1 %vm202_vm3, %v3470_v40  ;;  %v3497_v39 = vld [vmem:[%s4866_s0 + $0x1b0] sm:$0xff]  }
  0x8a   :  { %3088 = vmatprep.mubr.msk.bf16.mxu0 %vm3539_vm2, %v4869_v0  ;;  %3192 = vmatprep.mubr.msk.bf16.mxu1 %vm3539_vm2, %v4869_v0  ;;  %v3498_v40 = vld [vmem:[%s4866_s0 + $0x274] sm:$0xff]  }
  0x91   :  { %3089 = vmatmul.mubr.msk.bf16.gmra.mrb[68].mxu0 %vm202_vm3, %v3471_v41  ;;  %3193 = vmatmul.mubr.msk.bf16.gmra.mrb[68].mxu1 %vm202_vm3, %v3472_v42 }
  0x92   :  { %3092 = vmatprep.mubr.msk.bf16.mxu0 %vm3539_vm2, %v4869_v0  ;;  %3196 = vmatprep.mubr.msk.bf16.mxu1 %vm3539_vm2, %v4869_v0 }
  0x99   :  { %3093 = vmatmul.mubr.msk.bf16.gmra.mrb[72].mxu0 %vm202_vm3, %v3473_v43  ;;  %3197 = vmatmul.mubr.msk.bf16.gmra.mrb[72].mxu1 %vm202_vm3, %v3474_v44 }
  0x9a   :  { %3096 = vmatprep.mubr.msk.bf16.mxu0 %vm3539_vm2, %v4869_v0  ;;  %3200 = vmatprep.mubr.msk.bf16.mxu1 %vm3539_vm2, %v4869_v0 }
  0xa1   :  { %3097 = vmatmul.mubr.msk.bf16.gmra.mrb[76].mxu0 %vm202_vm3, %v3475_v45  ;;  %3201 = vmatmul.mubr.msk.bf16.gmra.mrb[76].mxu1 %vm202_vm3, %v3476_v46 }
  0xa2   :  { %3100 = vmatprep.mubr.msk.bf16.mxu0 %vm3539_vm2, %v4869_v0  ;;  %3204 = vmatprep.mubr.msk.bf16.mxu1 %vm3539_vm2, %v4869_v0 }
  0xa9   :  { %3101 = vmatmul.mubr.msk.bf16.gmra.mrb[80].mxu0 %vm202_vm3, %v3477_v47  ;;  %3205 = vmatmul.mubr.msk.bf16.gmra.mrb[80].mxu1 %vm202_vm3, %v3478_v48 }
  0xaa   :  { %3104 = vmatprep.mubr.msk.bf16.mxu0 %vm3539_vm2, %v4869_v0  ;;  %3208 = vmatprep.mubr.msk.bf16.mxu1 %vm3539_vm2, %v4869_v0 }
  0xb1   :  { %3105 = vmatmul.mubr.msk.bf16.gmra.mrb[84].mxu0 %vm202_vm3, %v3479_v49  ;;  %3209 = vmatmul.mubr.msk.bf16.gmra.mrb[84].mxu1 %vm202_vm3, %v3480_v50 }
  0xb2   :  { %3108 = vmatprep.mubr.msk.bf16.mxu0 %vm3539_vm2, %v4869_v0  ;;  %3212 = vmatprep.mubr.msk.bf16.mxu1 %vm3539_vm2, %v4869_v0 }
  0xb9   :  { %3109 = vmatmul.mubr.msk.bf16.gmra.mrb[88].mxu0 %vm202_vm3, %v3481_v51  ;;  %3213 = vmatmul.mubr.msk.bf16.gmra.mrb[88].mxu1 %vm202_vm3, %v3482_v52  ;;  %v3499_v51 = vld [vmem:[%s4866_s0 + $0x1b8] sm:$0xff]  }
  0xba   :  { %3112 = vmatprep.mubr.msk.bf16.mxu0 %vm3539_vm2, %v4869_v0  ;;  %3216 = vmatprep.mubr.msk.bf16.mxu1 %vm3539_vm2, %v4869_v0  ;;  %v3500_v52 = vld [vmem:[%s4866_s0 + $0x27c] sm:$0xff]  }
  0xc1   :  { %3113 = vmatmul.mubr.msk.bf16.gmra.mrb[92].mxu0 %vm202_vm3, %v3483_v53  ;;  %3217 = vmatmul.mubr.msk.bf16.gmra.mrb[92].mxu1 %vm202_vm3, %v3484_v54 }
  0xc2   :  { %3116 = vmatprep.mubr.msk.bf16.mxu0 %vm3539_vm2, %v4869_v0  ;;  %3220 = vmatprep.mubr.msk.bf16.mxu1 %vm3539_vm2, %v4869_v0 }
  0xc9   :  { %3117 = vmatmul.mubr.msk.bf16.gmra.mrb[96].mxu0 %vm202_vm3, %v3485_v55  ;;  %3221 = vmatmul.mubr.msk.bf16.gmra.mrb[96].mxu1 %vm202_vm3, %v3486_v56 }
  0xca   :  { %3228 = vmatprep.mubr.msk.bf16.mxu0 %vm3539_vm2, %v4869_v0  ;;  %3332 = vmatprep.mubr.msk.bf16.mxu1 %vm3539_vm2, %v4869_v0 }
  0xd1   :  { %3229 = vmatmul.mubr.msk.bf16.vlgmr.msra.gmra.mrb[100].mxu0 %vm202_vm3, %v3487_v57  ;;  %3333 = vmatmul.mubr.msk.bf16.vlgmr.msra.gmra.mrb[100].mxu1 %vm202_vm3, %v3488_v58 }
  0xd2   :  { %3232 = vmatprep.mubr.msk.bf16.mxu0 %vm3539_vm2, %v4869_v0  ;;  %3336 = vmatprep.mubr.msk.bf16.mxu1 %vm3539_vm2, %v4869_v0 }
  0xd9   :  { %3233 = vmatmul.mubr.msk.bf16.gmra.mrb[104].mxu0 %vm202_vm3, %v3489_v59  ;;  %3337 = vmatmul.mubr.msk.bf16.gmra.mrb[104].mxu1 %vm202_vm3, %v3490_v60 }
  0xda   :  { %3236 = vmatprep.mubr.msk.bf16.mxu0 %vm3539_vm2, %v4869_v0  ;;  %3340 = vmatprep.mubr.msk.bf16.mxu1 %vm3539_vm2, %v4869_v0 }
  0xdc   :  { %v3902_v61 = vpop.f32.mrb[0].mxu0  ;;  %v3904_v62 = vpop.f32.mrb[0].mxu1 }
  0xdd   :  { %v3022_v1 = vpop.f32.mrb[1].mxu0  ;;  %v3126_v2 = vpop.f32.mrb[1].mxu1 }
  0xde   :  { %v3914_v5 = vpop.f32.mrb[2].mxu0  ;;  %v3916_v6 = vpop.f32.mrb[2].mxu1 }
  0xdf   :  { %v3023_v8 = vpop.f32.mrb[3].mxu0  ;;  %v3127_v9 = vpop.f32.mrb[3].mxu1 }
  0xe1   :  { %3237 = vmatmul.mubr.msk.bf16.gmra.mrb[108].mxu0 %vm202_vm3, %v3491_v3  ;;  %3341 = vmatmul.mubr.msk.bf16.gmra.mrb[108].mxu1 %vm202_vm3, %v3492_v4  ;;  %v3501_v3 = vld [vmem:[%s4866_s0 + $0x1c0] sm:$0xff]  }
  0xe2   :  { %3240 = vmatprep.mubr.msk.bf16.mxu0 %vm3539_vm2, %v4869_v0  ;;  %3344 = vmatprep.mubr.msk.bf16.mxu1 %vm3539_vm2, %v4869_v0  ;;  %v3502_v4 = vld [vmem:[%s4866_s0 + $0x284] sm:$0xff]  }
  0xe4   :  { %v3926_v10 = vpop.f32.mrb[4].mxu0  ;;  %v3928_v11 = vpop.f32.mrb[4].mxu1 }
  0xe5   :  { %v3026_v13 = vpop.f32.mrb[5].mxu0  ;;  %v3130_v14 = vpop.f32.mrb[5].mxu1 }
  0xe6   :  { %v3938_v17 = vpop.f32.mrb[6].mxu0  ;;  %v3940_v18 = vpop.f32.mrb[6].mxu1 }
  0xe7   :  { %v3027_v20 = vpop.f32.mrb[7].mxu0  ;;  %v3131_v21 = vpop.f32.mrb[7].mxu1 }
  0xe9   :  { %3241 = vmatmul.mubr.msk.bf16.gmra.mrb[112].mxu0 %vm202_vm3, %v3493_v15  ;;  %3345 = vmatmul.mubr.msk.bf16.gmra.mrb[112].mxu1 %vm202_vm3, %v3494_v16 }
  0xea   :  { %3244 = vmatprep.mubr.msk.bf16.mxu0 %vm3539_vm2, %v4869_v0  ;;  %3348 = vmatprep.mubr.msk.bf16.mxu1 %vm3539_vm2, %v4869_v0 }
  0xec   :  { %v3950_v22 = vpop.f32.mrb[8].mxu0  ;;  %v3952_v23 = vpop.f32.mrb[8].mxu1 }
  0xed   :  { %v3030_v25 = vpop.f32.mrb[9].mxu0  ;;  %v3134_v26 = vpop.f32.mrb[9].mxu1 }
  0xee   :  { %v3962_v29 = vpop.f32.mrb[10].mxu0  ;;  %v3964_v30 = vpop.f32.mrb[10].mxu1 }
  0xef   :  { %v3031_v32 = vpop.f32.mrb[11].mxu0  ;;  %v3135_v33 = vpop.f32.mrb[11].mxu1 }
  0xf1   :  { %3245 = vmatmul.mubr.msk.bf16.gmra.mrb[116].mxu0 %vm202_vm3, %v3495_v27  ;;  %3349 = vmatmul.mubr.msk.bf16.gmra.mrb[116].mxu1 %vm202_vm3, %v3496_v28  ;;  %v3503_v27 = vld [vmem:[%s4866_s0 + $0x1c8] sm:$0xff]  }
  0xf2   :  { %3248 = vmatprep.mubr.msk.bf16.mxu0 %vm3539_vm2, %v4869_v0  ;;  %3352 = vmatprep.mubr.msk.bf16.mxu1 %vm3539_vm2, %v4869_v0  ;;  %v3504_v28 = vld [vmem:[%s4866_s0 + $0x28c] sm:$0xff]  }
  0xf4   :  { %v3974_v34 = vpop.f32.mrb[12].mxu0  ;;  %v3976_v35 = vpop.f32.mrb[12].mxu1 }
  0xf5   :  { %v3034_v37 = vpop.f32.mrb[13].mxu0  ;;  %v3138_v38 = vpop.f32.mrb[13].mxu1 }
  0xf6   :  { %v3986_v41 = vpop.f32.mrb[14].mxu0  ;;  %v3988_v42 = vpop.f32.mrb[14].mxu1 }
  0xf7   :  { %v3035_v44 = vpop.f32.mrb[15].mxu0  ;;  %v3139_v45 = vpop.f32.mrb[15].mxu1 }
  0xf9   :  { %3249 = vmatmul.mubr.msk.bf16.gmra.mrb[120].mxu0 %vm202_vm3, %v3497_v39  ;;  %3353 = vmatmul.mubr.msk.bf16.gmra.mrb[120].mxu1 %vm202_vm3, %v3498_v40 }
  0xfa   :  { %3252 = vmatprep.mubr.msk.bf16.mxu0 %vm3539_vm2, %v4869_v0  ;;  %3356 = vmatprep.mubr.msk.bf16.mxu1 %vm3539_vm2, %v4869_v0 }
  0xfc   :  { %v3998_v46 = vpop.f32.mrb[16].mxu0  ;;  %v4000_v47 = vpop.f32.mrb[16].mxu1 }
  0xfd   :  { %v3038_v49 = vpop.f32.mrb[17].mxu0  ;;  %v3142_v50 = vpop.f32.mrb[17].mxu1 }
  0xfe   :  { %v4010_v53 = vpop.f32.mrb[18].mxu0  ;;  %v4012_v54 = vpop.f32.mrb[18].mxu1 }
  0xff   :  { %v3039_v56 = vpop.f32.mrb[19].mxu0  ;;  %v3143_v57 = vpop.f32.mrb[19].mxu1 }
 0x101   :  { %3253 = vmatmul.mubr.msk.bf16.gmra.mrb[124].mxu0 %vm202_vm3, %v3499_v51  ;;  %3357 = vmatmul.mubr.msk.bf16.gmra.mrb[124].mxu1 %vm202_vm3, %v3500_v52  ;;  %v3505_v51 = vld [vmem:[%s4866_s0 + $0x1d0] sm:$0xff]  }
 0x102   :  { %3256 = vmatprep.mubr.msk.bf16.mxu0 %vm3539_vm2, %v4869_v0  ;;  %3360 = vmatprep.mubr.msk.bf16.mxu1 %vm3539_vm2, %v4869_v0  ;;  %v3506_v52 = vld [vmem:[%s4866_s0 + $0x294] sm:$0xff]  }
 0x104   :  { %v4022_v58 = vpop.f32.mrb[20].mxu0  ;;  %v4024_v59 = vpop.f32.mrb[20].mxu1 }
 0x105   :  { %v3042_v1 = vpop.f32.mrb[21].mxu0  ;;  %v3146_v2 = vpop.f32.mrb[21].mxu1 }
 0x106   :  { %v4034_v8 = vpop.f32.mrb[22].mxu0  ;;  %v4036_v9 = vpop.f32.mrb[22].mxu1 }
 0x107   :  { %v3043_v14 = vpop.f32.mrb[23].mxu0  ;;  %v3147_v15 = vpop.f32.mrb[23].mxu1 }
 0x109   :  { %3257 = vmatmul.mubr.msk.bf16.gmra.mrb[128].mxu0 %vm202_vm3, %v3501_v3  ;;  %3361 = vmatmul.mubr.msk.bf16.gmra.mrb[128].mxu1 %vm202_vm3, %v3502_v4 }
 0x10a   :  { %3260 = vmatprep.mubr.msk.bf16.mxu0 %vm3539_vm2, %v4869_v0  ;;  %3364 = vmatprep.mubr.msk.bf16.mxu1 %vm3539_vm2, %v4869_v0 }
 0x10c   :  { %v4046_v16 = vpop.f32.mrb[24].mxu0  ;;  %v4048_v20 = vpop.f32.mrb[24].mxu1 }
 0x10d   :  { %v3046_v25 = vpop.f32.mrb[25].mxu0  ;;  %v3150_v26 = vpop.f32.mrb[25].mxu1 }
 0x10e   :  { %v4058_v32 = vpop.f32.mrb[26].mxu0  ;;  %v4060_v33 = vpop.f32.mrb[26].mxu1 }
 0x10f   :  { %v3047_v38 = vpop.f32.mrb[27].mxu0  ;;  %v3151_v39 = vpop.f32.mrb[27].mxu1 }
 0x111   :  { %3261 = vmatmul.mubr.msk.bf16.gmra.mrb[132].mxu0 %vm202_vm3, %v3503_v27  ;;  %3365 = vmatmul.mubr.msk.bf16.gmra.mrb[132].mxu1 %vm202_vm3, %v3504_v28  ;;  %v3507_v27 = vld [vmem:[%s4866_s0 + $0x1d8] sm:$0xff]  }
 0x112   :  { %3264 = vmatprep.mubr.msk.bf16.mxu0 %vm3539_vm2, %v4869_v0  ;;  %3368 = vmatprep.mubr.msk.bf16.mxu1 %vm3539_vm2, %v4869_v0  ;;  %v3508_v28 = vld [vmem:[%s4866_s0 + $0x29c] sm:$0xff]  }
 0x114   :  { %v4070_v40 = vpop.f32.mrb[28].mxu0  ;;  %v4072_v44 = vpop.f32.mrb[28].mxu1 }
 0x115   :  { %v3050_v49 = vpop.f32.mrb[29].mxu0  ;;  %v3154_v50 = vpop.f32.mrb[29].mxu1 }
 0x116   :  { %v4082_v56 = vpop.f32.mrb[30].mxu0  ;;  %v4084_v57 = vpop.f32.mrb[30].mxu1 }
 0x117   :  { %v3051_v2 = vpop.f32.mrb[31].mxu0  ;;  %v3155_v3 = vpop.f32.mrb[31].mxu1 }
 0x119   :  { %3265 = vmatmul.mubr.msk.bf16.gmra.mrb[136].mxu0 %vm202_vm3, %v3505_v51  ;;  %3369 = vmatmul.mubr.msk.bf16.gmra.mrb[136].mxu1 %vm202_vm3, %v3506_v52 }
 0x11a   :  { %3268 = vmatprep.mubr.msk.bf16.mxu0 %vm3539_vm2, %v4869_v0  ;;  %3372 = vmatprep.mubr.msk.bf16.mxu1 %vm3539_vm2, %v4869_v0 }
 0x11c   :  { %v4094_v4 = vpop.f32.mrb[32].mxu0  ;;  %v4096_v14 = vpop.f32.mrb[32].mxu1 }
 0x11d   :  { %v3054_v25 = vpop.f32.mrb[33].mxu0  ;;  %v3158_v26 = vpop.f32.mrb[33].mxu1 }
 0x11e   :  { %v4106_v38 = vpop.f32.mrb[34].mxu0  ;;  %v4108_v39 = vpop.f32.mrb[34].mxu1 }
 0x11f   :  { %v3055_v50 = vpop.f32.mrb[35].mxu0  ;;  %v3159_v51 = vpop.f32.mrb[35].mxu1 }
 0x121   :  { %3269 = vmatmul.mubr.msk.bf16.gmra.mrb[140].mxu0 %vm202_vm3, %v3507_v27  ;;  %3373 = vmatmul.mubr.msk.bf16.gmra.mrb[140].mxu1 %vm202_vm3, %v3508_v28  ;;  %v3509_v27 = vld [vmem:[%s4866_s0 + $0x1e0] sm:$0xff]  }
 0x122   :  { %3272 = vmatprep.mubr.msk.bf16.mxu0 %vm3539_vm2, %v4869_v0  ;;  %3376 = vmatprep.mubr.msk.bf16.mxu1 %vm3539_vm2, %v4869_v0  ;;  %v3510_v28 = vld [vmem:[%s4866_s0 + $0x2a4] sm:$0xff]  }
 0x124   :  { %v4118_v52 = vpop.f32.mrb[36].mxu0  ;;  %v4120_v2 = vpop.f32.mrb[36].mxu1 }
 0x125   :  { %v3058_v25 = vpop.f32.mrb[37].mxu0  ;;  %v3162_v26 = vpop.f32.mrb[37].mxu1 }
 0x126   :  { %v4130_v50 = vpop.f32.mrb[38].mxu0  ;;  %v4132_v51 = vpop.f32.mrb[38].mxu1 }
 0x127   :  { %v3059_v15 = vpop.f32.mrb[39].mxu0  ;;  %v3163_v1 = vpop.f32.mrb[39].mxu1 }
 0x128   :  { %v3511_v1 = vld [vmem:[%s4866_s0 + $0x1e8] sm:$0xff]  }
 0x129   :  { %3273 = vmatmul.mubr.msk.bf16.gmra.mrb[144].mxu0 %vm202_vm3, %v3509_v27  ;;  %3377 = vmatmul.mubr.msk.bf16.gmra.mrb[144].mxu1 %vm202_vm3, %v3510_v28  ;;  %v3512_v27 = vld [vmem:[%s4866_s0 + $0x2ac] sm:$0xff]  }
 0x12a   :  { %3276 = vmatprep.mubr.msk.bf16.mxu0 %vm3539_vm2, %v4869_v0  ;;  %3380 = vmatprep.mubr.msk.bf16.mxu1 %vm3539_vm2, %v4869_v0 }
 0x12c   :  { %v4142_v25 = vpop.f32.mrb[40].mxu0  ;;  %v4144_v26 = vpop.f32.mrb[40].mxu1 }
 0x12d   :  { %v3062_v49 = vpop.f32.mrb[41].mxu0  ;;  %v3166_v15 = vpop.f32.mrb[41].mxu1 }
 0x12e   :  { %v4154_v28 = vpop.f32.mrb[42].mxu0  ;;  %v4156_v45 = vpop.f32.mrb[42].mxu1 }
 0x12f   :  { %v3063_v21 = vpop.f32.mrb[43].mxu0  ;;  %v3167_v13 = vpop.f32.mrb[43].mxu1 }
 0x130   :  { %v3513_v13 = vld [vmem:[%s4866_s0 + $0x1f0] sm:$0xff]  }
 0x131   :  { %3277 = vmatmul.mubr.msk.bf16.gmra.mrb[148].mxu0 %vm202_vm3, %v3511_v1  ;;  %3381 = vmatmul.mubr.msk.bf16.gmra.mrb[148].mxu1 %vm202_vm3, %v3512_v27  ;;  %v3514_v1 = vld [vmem:[%s4866_s0 + $0x2b4] sm:$0xff]  }
 0x132   :  { %3280 = vmatprep.mubr.msk.bf16.mxu0 %vm3539_vm2, %v4869_v0  ;;  %3384 = vmatprep.mubr.msk.bf16.mxu1 %vm3539_vm2, %v4869_v0 }
 0x134   :  { %v4166_v49 = vpop.f32.mrb[44].mxu0  ;;  %v4168_v15 = vpop.f32.mrb[44].mxu1 }
 0x135   :  { %v3066_v37 = vpop.f32.mrb[45].mxu0  ;;  %v3170_v21 = vpop.f32.mrb[45].mxu1 }
 0x136   :  { %v4178_v27 = vpop.f32.mrb[46].mxu0  ;;  %v4180_v60 = vpop.f32.mrb[46].mxu1 }
 0x137   :  { %4922 = vst [vmem:[#allocation2_spill] sm:$0xff] %v4180_v60  ;;  %v3067_v48 = vpop.f32.mrb[47].mxu0  ;;  %v3171_v43 = vpop.f32.mrb[47].mxu1 }
 0x138   :  { %v3515_v43 = vld [vmem:[%s4866_s0 + $0x1f8] sm:$0xff]  }
 0x139   :  { %3281 = vmatmul.mubr.msk.bf16.gmra.mrb[152].mxu0 %vm202_vm3, %v3513_v13  ;;  %3385 = vmatmul.mubr.msk.bf16.gmra.mrb[152].mxu1 %vm202_vm3, %v3514_v1  ;;  %v3516_v13 = vld [vmem:[%s4866_s0 + $0x2bc] sm:$0xff]  }
 0x13a   :  { %3284 = vmatprep.mubr.msk.bf16.mxu0 %vm3539_vm2, %v4869_v0  ;;  %3388 = vmatprep.mubr.msk.bf16.mxu1 %vm3539_vm2, %v4869_v0 }
 0x13c   :  { %v4190_v37 = vpop.f32.mrb[48].mxu0  ;;  %v4192_v21 = vpop.f32.mrb[48].mxu1 }
 0x13d   :  { %4923 = vst [vmem:[#allocation3_spill] sm:$0xff] %v4190_v37  ;;  %4924 = vst [vmem:[#allocation4_spill] sm:$0xff] %v4192_v21  ;;  %v3070_v55 = vpop.f32.mrb[49].mxu0  ;;  %v3174_v48 = vpop.f32.mrb[49].mxu1 }
 0x13e   :  { %v4202_v1 = vpop.f32.mrb[50].mxu0  ;;  %v4204_v36 = vpop.f32.mrb[50].mxu1 }
 0x13f   :  { %4925 = vst [vmem:[#allocation5_spill] sm:$0xff] %v4202_v1  ;;  %4926 = vst [vmem:[#allocation6_spill] sm:$0xff] %v4204_v36  ;;  %v3071_v24 = vpop.f32.mrb[51].mxu0  ;;  %v3175_v19 = vpop.f32.mrb[51].mxu1 }
 0x140   :  { %v3517_v19 = vld [vmem:[%s4866_s0 + $0x200] sm:$0xff]  }
 0x141   :  { %3285 = vmatmul.mubr.msk.bf16.gmra.mrb[156].mxu0 %vm202_vm3, %v3515_v43  ;;  %3389 = vmatmul.mubr.msk.bf16.gmra.mrb[156].mxu1 %vm202_vm3, %v3516_v13  ;;  %v3518_v43 = vld [vmem:[%s4866_s0 + $0x2c4] sm:$0xff]  }
 0x142   :  { %3288 = vmatprep.mubr.msk.bf16.mxu0 %vm3539_vm2, %v4869_v0  ;;  %3392 = vmatprep.mubr.msk.bf16.mxu1 %vm3539_vm2, %v4869_v0 }
 0x144   :  { %v4214_v55 = vpop.f32.mrb[52].mxu0  ;;  %v4216_v48 = vpop.f32.mrb[52].mxu1 }
 0x145   :  { %4927 = vst [vmem:[#allocation7_spill] sm:$0xff] %v4214_v55  ;;  %4928 = vst [vmem:[#allocation8_spill] sm:$0xff] %v4216_v48  ;;  %v3074_v31 = vpop.f32.mrb[53].mxu0  ;;  %v3178_v24 = vpop.f32.mrb[53].mxu1 }
 0x146   :  { %v4226_v13 = vpop.f32.mrb[54].mxu0  ;;  %v4228_v12 = vpop.f32.mrb[54].mxu1  ;;  %v4931_v31 = vmov 0.0  }
 0x147   :  { %4929 = vst [vmem:[#allocation9_spill] sm:$0xff] %v4226_v13  ;;  %4930 = vst [vmem:[#allocation10_spill] sm:$0xff] %v4228_v12  ;;  %v3075_v63 = vpop.f32.mrb[55].mxu0  ;;  %v3179_v0 = vpop.f32.mrb[55].mxu1 }
 0x148   :  { %v3519_v0 = vld [vmem:[%s4866_s0 + $0x208] sm:$0xff]  }
 0x149   :  { %3289 = vmatmul.mubr.msk.bf16.gmra.mrb[160].mxu0 %vm202_vm3, %v3517_v19  ;;  %3393 = vmatmul.mubr.msk.bf16.gmra.mrb[160].mxu1 %vm202_vm3, %v3518_v43  ;;  %v3520_v19 = vld [vmem:[%s4866_s0 + $0x2cc] sm:$0xff]  }
 0x14a   :  { %3292 = vmatprep.mubr.msk.bf16.mxu0 %vm3539_vm2, %v4931_v31  ;;  %3396 = vmatprep.mubr.msk.bf16.mxu1 %vm3539_vm2, %v4931_v31 }
 0x14c   :  { %v4238_v24 = vpop.f32.mrb[56].mxu0  ;;  %v4240_v3 = vpop.f32.mrb[56].mxu1 }
 0x14d   :  { %4932 = vst [vmem:[#allocation11_spill] sm:$0xff] %v4238_v24  ;;  %4933 = vst [vmem:[#allocation12_spill] sm:$0xff] %v4240_v3  ;;  %v3078_v7 = vpop.f32.mrb[57].mxu0  ;;  %v3182_v63 = vpop.f32.mrb[57].mxu1 }
 0x14e   :  { %v4250_v43 = vpop.f32.mrb[58].mxu0  ;;  %v4252_v12 = vpop.f32.mrb[58].mxu1 }
 0x14f   :  { %4934 = vst [vmem:[#allocation13_spill] sm:$0xff] %v4250_v43  ;;  %4935 = vst [vmem:[#allocation14_spill] sm:$0xff] %v4252_v12  ;;  %v3079_v55 = vpop.f32.mrb[59].mxu0  ;;  %v3183_v36 = vpop.f32.mrb[59].mxu1 }
 0x150   :  { %v3521_v36 = vld [vmem:[%s4866_s0 + $0x210] sm:$0xff]  }
 0x151   :  { %3293 = vmatmul.mubr.msk.bf16.gmra.mrb[164].mxu0 %vm202_vm3, %v3519_v0  ;;  %3397 = vmatmul.mubr.msk.bf16.gmra.mrb[164].mxu1 %vm202_vm3, %v3520_v19  ;;  %v3522_v0 = vld [vmem:[%s4866_s0 + $0x2d4] sm:$0xff]  }
 0x152   :  { %3296 = vmatprep.mubr.msk.bf16.mxu0 %vm3539_vm2, %v4931_v31  ;;  %3400 = vmatprep.mubr.msk.bf16.mxu1 %vm3539_vm2, %v4931_v31 }
 0x154   :  { %v4262_v7 = vpop.f32.mrb[60].mxu0  ;;  %v4264_v63 = vpop.f32.mrb[60].mxu1 }
 0x155   :  { %4936 = vst [vmem:[#allocation15_spill] sm:$0xff] %v4262_v7  ;;  %4937 = vst [vmem:[#allocation16_spill] sm:$0xff] %v4264_v63  ;;  %v3082_v13 = vpop.f32.mrb[61].mxu0  ;;  %v3186_v55 = vpop.f32.mrb[61].mxu1 }
 0x156   :  { %v4274_v19 = vpop.f32.mrb[62].mxu0  ;;  %v4276_v12 = vpop.f32.mrb[62].mxu1 }
 0x157   :  { %4938 = vst [vmem:[#allocation17_spill] sm:$0xff] %v4274_v19  ;;  %4939 = vst [vmem:[#allocation18_spill] sm:$0xff] %v4276_v12  ;;  %v3083_v3 = vpop.f32.mrb[63].mxu0  ;;  %v3187_v24 = vpop.f32.mrb[63].mxu1 }
 0x158   :  { %v3523_v24 = vld [vmem:[%s4866_s0 + $0x218] sm:$0xff]  }
 0x159   :  { %3297 = vmatmul.mubr.msk.bf16.gmra.mrb[168].mxu0 %vm202_vm3, %v3521_v36  ;;  %3401 = vmatmul.mubr.msk.bf16.gmra.mrb[168].mxu1 %vm202_vm3, %v3522_v0  ;;  %v3524_v36 = vld [vmem:[%s4866_s0 + $0x2dc] sm:$0xff]  }
 0x15a   :  { %3300 = vmatprep.mubr.msk.bf16.mxu0 %vm3539_vm2, %v4931_v31  ;;  %3404 = vmatprep.mubr.msk.bf16.mxu1 %vm3539_vm2, %v4931_v31 }
 0x15c   :  { %v4286_v13 = vpop.f32.mrb[64].mxu0  ;;  %v4288_v55 = vpop.f32.mrb[64].mxu1 }
 0x15d   :  { %4940 = vst [vmem:[#allocation19_spill] sm:$0xff] %v4286_v13  ;;  %4941 = vst [vmem:[#allocation20_spill] sm:$0xff] %v4288_v55  ;;  %v3086_v43 = vpop.f32.mrb[65].mxu0  ;;  %v3190_v3 = vpop.f32.mrb[65].mxu1 }
 0x15e   :  { %v4298_v0 = vpop.f32.mrb[66].mxu0  ;;  %v4300_v12 = vpop.f32.mrb[66].mxu1 }
 0x15f   :  { %4942 = vst [vmem:[#allocation21_spill] sm:$0xff] %v4298_v0  ;;  %4943 = vst [vmem:[#allocation22_spill] sm:$0xff] %v4300_v12  ;;  %v3087_v63 = vpop.f32.mrb[67].mxu0  ;;  %v3191_v7 = vpop.f32.mrb[67].mxu1 }
 0x160   :  { %v3525_v7 = vld [vmem:[%s4866_s0 + $0x220] sm:$0xff]  }
 0x161   :  { %3301 = vmatmul.mubr.msk.bf16.gmra.mrb[172].mxu0 %vm202_vm3, %v3523_v24  ;;  %3405 = vmatmul.mubr.msk.bf16.gmra.mrb[172].mxu1 %vm202_vm3, %v3524_v36  ;;  %v3526_v24 = vld [vmem:[%s4866_s0 + $0x2e4] sm:$0xff]  }
 0x162   :  { %3304 = vmatprep.mubr.msk.bf16.mxu0 %vm3539_vm2, %v4931_v31  ;;  %3408 = vmatprep.mubr.msk.bf16.mxu1 %vm3539_vm2, %v4931_v31 }
 0x164   :  { %v4310_v43 = vpop.f32.mrb[68].mxu0  ;;  %v4312_v3 = vpop.f32.mrb[68].mxu1 }
 0x165   :  { %4944 = vst [vmem:[#allocation23_spill] sm:$0xff] %v4310_v43  ;;  %4945 = vst [vmem:[#allocation24_spill] sm:$0xff] %v4312_v3  ;;  %v3090_v19 = vpop.f32.mrb[69].mxu0  ;;  %v3194_v63 = vpop.f32.mrb[69].mxu1 }
 0x166   :  { %v4322_v36 = vpop.f32.mrb[70].mxu0  ;;  %v4324_v12 = vpop.f32.mrb[70].mxu1 }
 0x167   :  { %4946 = vst [vmem:[#allocation25_spill] sm:$0xff] %v4322_v36  ;;  %4947 = vst [vmem:[#allocation26_spill] sm:$0xff] %v4324_v12  ;;  %v3091_v55 = vpop.f32.mrb[71].mxu0  ;;  %v3195_v13 = vpop.f32.mrb[71].mxu1 }
 0x168   :  { %v3527_v13 = vld [vmem:[%s4866_s0 + $0x228] sm:$0xff]  }
 0x169   :  { %3305 = vmatmul.mubr.msk.bf16.gmra.mrb[176].mxu0 %vm202_vm3, %v3525_v7  ;;  %3409 = vmatmul.mubr.msk.bf16.gmra.mrb[176].mxu1 %vm202_vm3, %v3526_v24  ;;  %v3528_v7 = vld [vmem:[%s4866_s0 + $0x2ec] sm:$0xff]  }
 0x16a   :  { %3308 = vmatprep.mubr.msk.bf16.mxu0 %vm3539_vm2, %v4931_v31  ;;  %3412 = vmatprep.mubr.msk.bf16.mxu1 %vm3539_vm2, %v4931_v31 }
 0x16c   :  { %v4334_v19 = vpop.f32.mrb[72].mxu0  ;;  %v4336_v63 = vpop.f32.mrb[72].mxu1 }
 0x16d   :  { %4948 = vst [vmem:[#allocation27_spill] sm:$0xff] %v4334_v19  ;;  %4949 = vst [vmem:[#allocation28_spill] sm:$0xff] %v4336_v63  ;;  %v3094_v0 = vpop.f32.mrb[73].mxu0  ;;  %v3198_v55 = vpop.f32.mrb[73].mxu1 }
 0x16e   :  { %v4346_v24 = vpop.f32.mrb[74].mxu0  ;;  %v4348_v12 = vpop.f32.mrb[74].mxu1 }
 0x16f   :  { %4950 = vst [vmem:[#allocation29_spill] sm:$0xff] %v4346_v24  ;;  %4951 = vst [vmem:[#allocation30_spill] sm:$0xff] %v4348_v12  ;;  %v3095_v3 = vpop.f32.mrb[75].mxu0  ;;  %v3199_v43 = vpop.f32.mrb[75].mxu1 }
 0x170   :  { %v3529_v43 = vld [vmem:[%s4866_s0 + $0x230] sm:$0xff]  }
 0x171   :  { %3309 = vmatmul.mubr.msk.bf16.gmra.mrb[180].mxu0 %vm202_vm3, %v3527_v13  ;;  %3413 = vmatmul.mubr.msk.bf16.gmra.mrb[180].mxu1 %vm202_vm3, %v3528_v7  ;;  %v3530_v13 = vld [vmem:[%s4866_s0 + $0x2f4] sm:$0xff]  }
 0x172   :  { %3312 = vmatprep.mubr.msk.bf16.mxu0 %vm3539_vm2, %v4931_v31  ;;  %3416 = vmatprep.mubr.msk.bf16.mxu1 %vm3539_vm2, %v4931_v31 }
 0x174   :  { %v4358_v0 = vpop.f32.mrb[76].mxu0  ;;  %v4360_v55 = vpop.f32.mrb[76].mxu1 }
 0x175   :  { %4952 = vst [vmem:[#allocation31_spill] sm:$0xff] %v4358_v0  ;;  %4953 = vst [vmem:[#allocation32_spill] sm:$0xff] %v4360_v55  ;;  %v3098_v36 = vpop.f32.mrb[77].mxu0  ;;  %v3202_v3 = vpop.f32.mrb[77].mxu1 }
 0x176   :  { %v4370_v7 = vpop.f32.mrb[78].mxu0  ;;  %v4372_v12 = vpop.f32.mrb[78].mxu1 }
 0x177   :  { %4954 = vst [vmem:[#allocation33_spill] sm:$0xff] %v4370_v7  ;;  %4955 = vst [vmem:[#allocation34_spill] sm:$0xff] %v4372_v12  ;;  %v3099_v63 = vpop.f32.mrb[79].mxu0  ;;  %v3203_v19 = vpop.f32.mrb[79].mxu1 }
 0x178   :  { %v3531_v19 = vld [vmem:[%s4866_s0 + $0x238] sm:$0xff]  }
 0x179   :  { %3313 = vmatmul.mubr.msk.bf16.gmra.mrb[184].mxu0 %vm202_vm3, %v3529_v43  ;;  %3417 = vmatmul.mubr.msk.bf16.gmra.mrb[184].mxu1 %vm202_vm3, %v3530_v13  ;;  %v3532_v43 = vld [vmem:[%s4866_s0 + $0x2fc] sm:$0xff]  }
 0x17a   :  { %3316 = vmatprep.mubr.msk.bf16.mxu0 %vm3539_vm2, %v4931_v31  ;;  %3420 = vmatprep.mubr.msk.bf16.mxu1 %vm3539_vm2, %v4931_v31 }
 0x17c   :  { %v4382_v36 = vpop.f32.mrb[80].mxu0  ;;  %v4384_v3 = vpop.f32.mrb[80].mxu1 }
 0x17d   :  { %4956 = vst [vmem:[#allocation35_spill] sm:$0xff] %v4382_v36  ;;  %4957 = vst [vmem:[#allocation36_spill] sm:$0xff] %v4384_v3  ;;  %v3102_v24 = vpop.f32.mrb[81].mxu0  ;;  %v3206_v63 = vpop.f32.mrb[81].mxu1 }
 0x17e   :  { %v4394_v13 = vpop.f32.mrb[82].mxu0  ;;  %v4396_v12 = vpop.f32.mrb[82].mxu1 }
 0x17f   :  { %4958 = vst [vmem:[#allocation37_spill] sm:$0xff] %v4394_v13  ;;  %4959 = vst [vmem:[#allocation38_spill] sm:$0xff] %v4396_v12  ;;  %v3103_v55 = vpop.f32.mrb[83].mxu0  ;;  %v3207_v0 = vpop.f32.mrb[83].mxu1 }
 0x180   :  { %v3533_v0 = vld [vmem:[%s4866_s0 + $0x240] sm:$0xff]  }
 0x181   :  { %3317 = vmatmul.mubr.msk.bf16.gmra.mrb[188].mxu0 %vm202_vm3, %v3531_v19  ;;  %3421 = vmatmul.mubr.msk.bf16.gmra.mrb[188].mxu1 %vm202_vm3, %v3532_v43  ;;  %v3534_v19 = vld [vmem:[%s4866_s0 + $0x304] sm:$0xff]  }
 0x182   :  { %3320 = vmatprep.mubr.msk.bf16.mxu0 %vm3539_vm2, %v4931_v31  ;;  %3424 = vmatprep.mubr.msk.bf16.mxu1 %vm3539_vm2, %v4931_v31 }
 0x184   :  { %v4406_v24 = vpop.f32.mrb[84].mxu0  ;;  %v4408_v63 = vpop.f32.mrb[84].mxu1 }
 0x185   :  { %4960 = vst [vmem:[#allocation39_spill] sm:$0xff] %v4406_v24  ;;  %4961 = vst [vmem:[#allocation40_spill] sm:$0xff] %v4408_v63  ;;  %v3106_v7 = vpop.f32.mrb[85].mxu0  ;;  %v3210_v55 = vpop.f32.mrb[85].mxu1 }
 0x186   :  { %v4418_v43 = vpop.f32.mrb[86].mxu0  ;;  %v4420_v12 = vpop.f32.mrb[86].mxu1 }
 0x187   :  { %4962 = vst [vmem:[#allocation41_spill] sm:$0xff] %v4418_v43  ;;  %4963 = vst [vmem:[#allocation42_spill] sm:$0xff] %v4420_v12  ;;  %v3107_v3 = vpop.f32.mrb[87].mxu0  ;;  %v3211_v36 = vpop.f32.mrb[87].mxu1 }
 0x188   :  { %v3535_v36 = vld [vmem:[%s4866_s0 + $0x248] ss:$0 sps:$4 sm:$0xff]  }
 0x189   :  { %3321 = vmatmul.mubr.msk.bf16.gmra.mrb[192].mxu0 %vm202_vm3, %v3533_v0  ;;  %3425 = vmatmul.mubr.msk.bf16.gmra.mrb[192].mxu1 %vm202_vm3, %v3534_v19  ;;  %v3536_v0 = vld [vmem:[%s4866_s0 + $0x30c] ss:$0 sps:$4 sm:$0xff]  }
 0x18a   :  { %3324 = vmatprep.mubr.msk.bf16.mxu0 %vm3539_vm2, %v4931_v31  ;;  %3428 = vmatprep.mubr.msk.bf16.mxu1 %vm3539_vm2, %v4931_v31 }
 0x18c   :  { %v4430_v7 = vpop.f32.mrb[88].mxu0  ;;  %v4432_v55 = vpop.f32.mrb[88].mxu1 }
 0x18d   :  { %4964 = vst [vmem:[#allocation43_spill] sm:$0xff] %v4430_v7  ;;  %4965 = vst [vmem:[#allocation44_spill] sm:$0xff] %v4432_v55  ;;  %v3110_v13 = vpop.f32.mrb[89].mxu0  ;;  %v3214_v3 = vpop.f32.mrb[89].mxu1 }
 0x18e   :  { %v4442_v19 = vpop.f32.mrb[90].mxu0  ;;  %v4444_v31 = vpop.f32.mrb[90].mxu1 }
 0x18f   :  { %4966 = vst [vmem:[#allocation45_spill] sm:$0xff] %v4442_v19  ;;  %4967 = vst [vmem:[#allocation46_spill] sm:$0xff] %v4444_v31  ;;  %v3111_v43 = vpop.f32.mrb[91].mxu0  ;;  %v3215_v63 = vpop.f32.mrb[91].mxu1 }
 0x190   :  { %v4974_v63 = vmax.f32 %v3902_v61, %v3904_v62 }
 0x191   :  { %3325 = vmatmul.mubr.msk.bf16.gmra.mrb[196].mxu0 %vm202_vm3, %v3535_v36  ;;  %3429 = vmatmul.mubr.msk.bf16.gmra.mrb[196].mxu1 %vm202_vm3, %v3536_v0 }
 0x194   :  { %v4450_v13 = vpop.f32.mrb[92].mxu0  ;;  %v4452_v3 = vpop.f32.mrb[92].mxu1 }
 0x195   :  { %4968 = vst [vmem:[#allocation47_spill] sm:$0xff] %v4450_v13  ;;  %4969 = vst [vmem:[#allocation48_spill] sm:$0xff] %v4452_v3  ;;  %v3114_v55 = vpop.f32.mrb[93].mxu0  ;;  %v3218_v7 = vpop.f32.mrb[93].mxu1 }
 0x196   :  { %v4456_v24 = vpop.f32.mrb[94].mxu0  ;;  %v4458_v1 = vpop.f32.mrb[94].mxu1 }
 0x197   :  { %4970 = vst [vmem:[#allocation49_spill] sm:$0xff] %v4456_v24  ;;  %4971 = vst [vmem:[#allocation50_spill] sm:$0xff] %v4458_v1  ;;  %v3115_v43 = vpop.f32.mrb[95].mxu0  ;;  %v3219_v36 = vpop.f32.mrb[95].mxu1  ;;  %v4474_v24 = vld [vmem:[%s4867_s2] ss:$0 sm:$0xff] }
 0x19c   :  { %v4462_v12 = vpop.f32.mrb[96].mxu0  ;;  %v4464_v0 = vpop.f32.mrb[96].mxu1 }
 0x19d   :  { %4972 = vst [vmem:[#allocation51_spill] sm:$0xff] %v4462_v12  ;;  %4973 = vst [vmem:[#allocation52_spill] sm:$0xff] %v4464_v0  ;;  %v3118_v19 = vpop.f32.mrb[97].mxu0  ;;  %v3222_v48 = vpop.f32.mrb[97].mxu1 }
 0x19e   :  { %v514_v55 = vpop.f32.mrb[98].mxu0  ;;  %v994_v7 = vpop.f32.mrb[98].mxu1 }
 0x19f   :  { %v3119_v3 = vpop.f32.mrb[99].mxu0  ;;  %v3223_v13 = vpop.f32.mrb[99].mxu1 }
 0x1a0   :  { %v4975_v3 = vmax.f32 %v3914_v5, %v3916_v6 }
 0x1a4   :  { %v1328_v21 = vpop.f32.mrb[100].mxu0  ;;  %v1857_v37 = vpop.f32.mrb[100].mxu1 }
 0x1a5   :  { %v1526_v43 = vmax.f32 %v4974_v63, %v1328_v21  ;;  %v3230_v36 = vpop.f32.mrb[101].mxu0  ;;  %v3334_v1 = vpop.f32.mrb[101].mxu1 }
 0x1a6   :  { %v1331_v31 = vpop.f32.mrb[102].mxu0  ;;  %v1860_v19 = vpop.f32.mrb[102].mxu1 }
 0x1a7   :  { %v2055_v48 = vmax.f32 %v1526_v43, %v1857_v37  ;;  %v1527_v13 = vmax.f32 %v4975_v3, %v1331_v31  ;;  %v3231_v55 = vpop.f32.mrb[103].mxu0  ;;  %v3335_v7 = vpop.f32.mrb[103].mxu1  ;;  %v4976_v37 = vmax.f32 %v3926_v10, %v3928_v11 }
 0x1a9   :  { %v2111_v0 = vadd.f32 %v4474_v24, %v2055_v48  ;;  %v2056_v61 = vmax.f32 %v1527_v13, %v1860_v19  ;;  %v4977_v48 = vmax.f32 %v3938_v17, %v3940_v18  ;;  %v4978_v17 = vmax.f32 %v3950_v22, %v3952_v23 }
 0x1ab   :  { %v2160_v62 = vmax.f32 %v2111_v0, 0.0  ;;  %v2112_v21 = vadd.f32 %v4474_v24, %v2056_v61 }
 0x1ac   :  { %v1336_v1 = vpop.f32.mrb[104].mxu0  ;;  %v1865_v63 = vpop.f32.mrb[104].mxu1 }
 0x1ad   :  { %v2859_v36 = vpack.c.bf16 %v2160_v62, %v2160_v62  ;;  %v2161_v12 = vmax.f32 %v2112_v21, 0.0  ;;  %v1528_v43 = vmax.f32 %v4976_v37, %v1336_v1  ;;  %v3234_v60 = vpop.f32.mrb[105].mxu0  ;;  %v3338_v5 = vpop.f32.mrb[105].mxu1 }
 0x1ae   :  { %v1339_v6 = vpop.f32.mrb[106].mxu0  ;;  %v1868_v31 = vpop.f32.mrb[106].mxu1 }
 0x1af   :  { %2407 = vst.msk [vmem:[%s4868_s3] sm:$0xf] %vm2406_vm4, %v2859_v36  ;;  %v2860_v0 = vpack.c.bf16 %v2161_v12, %v2161_v12  ;;  %v2057_v19 = vmax.f32 %v1528_v43, %v1865_v63  ;;  %v1529_v3 = vmax.f32 %v4977_v48, %v1339_v6  ;;  %v3235_v13 = vpop.f32.mrb[107].mxu0  ;;  %v3339_v55 = vpop.f32.mrb[107].mxu1  ;;  %v4979_v6 = vmax.f32 %v3962_v29, %v3964_v30 }
 0x1b0   :  { %v4980_v29 = vmax.f32 %v3974_v34, %v3976_v35 }
 0x1b1   :  { %2408 = vst.msk [vmem:[%s4868_s3 + $0x4] sm:$0xf] %vm2406_vm4, %v2860_v0  ;;  %v2113_v10 = vadd.f32 %v4474_v24, %v2057_v19  ;;  %v2058_v11 = vmax.f32 %v1529_v3, %v1868_v31 }
 0x1b3   :  { %v2162_v60 = vmax.f32 %v2113_v10, 0.0  ;;  %v2114_v7 = vadd.f32 %v4474_v24, %v2058_v11 }
 0x1b4   :  { %v1344_v61 = vpop.f32.mrb[108].mxu0  ;;  %v1873_v12 = vpop.f32.mrb[108].mxu1 }
 0x1b5   :  { %v2861_v62 = vpack.c.bf16 %v2162_v60, %v2162_v60  ;;  %v2163_v21 = vmax.f32 %v2114_v7, 0.0  ;;  %v1530_v18 = vmax.f32 %v4978_v17, %v1344_v61  ;;  %v3238_v1 = vpop.f32.mrb[109].mxu0  ;;  %v3342_v63 = vpop.f32.mrb[109].mxu1  ;;  %v4981_v17 = vmax.f32 %v3986_v41, %v3988_v42 }
 0x1b6   :  { %v1347_v36 = vpop.f32.mrb[110].mxu0  ;;  %v1876_v37 = vpop.f32.mrb[110].mxu1  ;;  %v4982_v41 = vmax.f32 %v3998_v46, %v4000_v47 }
 0x1b7   :  { %2409 = vst.msk [vmem:[%s4868_s3 + $0x8] sm:$0xf] %vm2406_vm4, %v2861_v62  ;;  %v2862_v43 = vpack.c.bf16 %v2163_v21, %v2163_v21  ;;  %v2059_v5 = vmax.f32 %v1530_v18, %v1873_v12  ;;  %v1531_v31 = vmax.f32 %v4979_v6, %v1347_v36  ;;  %v3239_v0 = vpop.f32.mrb[111].mxu0  ;;  %v3343_v19 = vpop.f32.mrb[111].mxu1 }
 0x1b9   :  { %2410 = vst.msk [vmem:[%s4868_s3 + $0xc] sm:$0xf] %vm2406_vm4, %v2862_v43  ;;  %v2115_v22 = vadd.f32 %v4474_v24, %v2059_v5  ;;  %v2060_v23 = vmax.f32 %v1531_v31, %v1876_v37 }
 0x1bb   :  { %v2164_v48 = vmax.f32 %v2115_v22, 0.0  ;;  %v2116_v3 = vadd.f32 %v4474_v24, %v2060_v23 }
 0x1bc   :  { %v1352_v13 = vpop.f32.mrb[112].mxu0  ;;  %v1881_v55 = vpop.f32.mrb[112].mxu1 }
 0x1bd   :  { %v2863_v10 = vpack.c.bf16 %v2164_v48, %v2164_v48  ;;  %v2165_v11 = vmax.f32 %v2116_v3, 0.0  ;;  %v1532_v30 = vmax.f32 %v4980_v29, %v1352_v13  ;;  %v3242_v60 = vpop.f32.mrb[113].mxu0  ;;  %v3346_v7 = vpop.f32.mrb[113].mxu1  ;;  %v4983_v13 = vmax.f32 %v4010_v53, %v4012_v54 }
 0x1be   :  { %v1355_v61 = vpop.f32.mrb[114].mxu0  ;;  %v1884_v12 = vpop.f32.mrb[114].mxu1  ;;  %v4984_v53 = vmax.f32 %v4022_v58, %v4024_v59 }
 0x1bf   :  { %2411 = vst.msk [vmem:[%s4868_s3 + $0x10] sm:$0xf] %vm2406_vm4, %v2863_v10  ;;  %v2864_v62 = vpack.c.bf16 %v2165_v11, %v2165_v11  ;;  %v2061_v21 = vmax.f32 %v1532_v30, %v1881_v55  ;;  %v1533_v18 = vmax.f32 %v4981_v17, %v1355_v61  ;;  %v3243_v1 = vpop.f32.mrb[115].mxu0  ;;  %v3347_v63 = vpop.f32.mrb[115].mxu1 }
 0x1c1   :  { %2412 = vst.msk [vmem:[%s4868_s3 + $0x14] sm:$0xf] %vm2406_vm4, %v2864_v62  ;;  %v2117_v34 = vadd.f32 %v4474_v24, %v2061_v21  ;;  %v2062_v35 = vmax.f32 %v1533_v18, %v1884_v12 }
 0x1c3   :  { %v2166_v36 = vmax.f32 %v2117_v34, 0.0  ;;  %v2118_v37 = vadd.f32 %v4474_v24, %v2062_v35  ;;  %v4985_v34 = vmax.f32 %v4034_v8, %v4036_v9  ;;  %v4986_v8 = vmax.f32 %v4046_v16, %v4048_v20 }
 0x1c4   :  { %v1360_v43 = vpop.f32.mrb[116].mxu0  ;;  %v1889_v5 = vpop.f32.mrb[116].mxu1 }
 0x1c5   :  { %v2865_v6 = vpack.c.bf16 %v2166_v36, %v2166_v36  ;;  %v2167_v31 = vmax.f32 %v2118_v37, 0.0  ;;  %v1534_v42 = vmax.f32 %v4982_v41, %v1360_v43  ;;  %v3246_v0 = vpop.f32.mrb[117].mxu0  ;;  %v3350_v19 = vpop.f32.mrb[117].mxu1 }
 0x1c6   :  { %v1363_v22 = vpop.f32.mrb[118].mxu0  ;;  %v1892_v23 = vpop.f32.mrb[118].mxu1 }
 0x1c7   :  { %2413 = vst.msk [vmem:[%s4868_s3 + $0x18] sm:$0xf] %vm2406_vm4, %v2865_v6  ;;  %v2866_v48 = vpack.c.bf16 %v2167_v31, %v2167_v31  ;;  %v2063_v3 = vmax.f32 %v1534_v42, %v1889_v5  ;;  %v1535_v55 = vmax.f32 %v4983_v13, %v1363_v22  ;;  %v3247_v10 = vpop.f32.mrb[119].mxu0  ;;  %v3351_v11 = vpop.f32.mrb[119].mxu1  ;;  %v4987_v13 = vmax.f32 %v4058_v32, %v4060_v33 }
 0x1c8   :  { %v4988_v32 = vmax.f32 %v4070_v40, %v4072_v44 }
 0x1c9   :  { %2414 = vst.msk [vmem:[%s4868_s3 + $0x1c] sm:$0xf] %vm2406_vm4, %v2866_v48  ;;  %v2119_v46 = vadd.f32 %v4474_v24, %v2063_v3  ;;  %v2064_v47 = vmax.f32 %v1535_v55, %v1892_v23 }
 0x1cb   :  { %v2168_v29 = vmax.f32 %v2119_v46, 0.0  ;;  %v2120_v30 = vadd.f32 %v4474_v24, %v2064_v47 }
 0x1cc   :  { %v1368_v60 = vpop.f32.mrb[120].mxu0  ;;  %v1897_v7 = vpop.f32.mrb[120].mxu1 }
 0x1cd   :  { %v2867_v61 = vpack.c.bf16 %v2168_v29, %v2168_v29  ;;  %v2169_v12 = vmax.f32 %v2120_v30, 0.0  ;;  %v1536_v54 = vmax.f32 %v4984_v53, %v1368_v60  ;;  %v3250_v62 = vpop.f32.mrb[121].mxu0  ;;  %v3354_v21 = vpop.f32.mrb[121].mxu1 }
 0x1ce   :  { %v1371_v17 = vpop.f32.mrb[122].mxu0  ;;  %v1900_v18 = vpop.f32.mrb[122].mxu1 }
 0x1cf   :  { %2415 = vst.msk [vmem:[%s4868_s3 + $0x20] sm:$0xf] %vm2406_vm4, %v2867_v61  ;;  %v2868_v1 = vpack.c.bf16 %v2169_v12, %v2169_v12  ;;  %v2065_v63 = vmax.f32 %v1536_v54, %v1897_v7  ;;  %v1537_v35 = vmax.f32 %v4985_v34, %v1371_v17  ;;  %v3251_v36 = vpop.f32.mrb[123].mxu0  ;;  %v3355_v37 = vpop.f32.mrb[123].mxu1  ;;  %v4989_v17 = vmax.f32 %v4082_v56, %v4084_v57 }
 0x1d0   :  { %v4990_v56 = vmax.f32 %v4094_v4, %v4096_v14 }
 0x1d1   :  { %2416 = vst.msk [vmem:[%s4868_s3 + $0x24] sm:$0xf] %vm2406_vm4, %v2868_v1  ;;  %v2121_v58 = vadd.f32 %v4474_v24, %v2065_v63  ;;  %v2066_v59 = vmax.f32 %v1537_v35, %v1900_v18 }
 0x1d3   :  { %v2170_v43 = vmax.f32 %v2121_v58, 0.0  ;;  %v2122_v5 = vadd.f32 %v4474_v24, %v2066_v59 }
 0x1d4   :  { %v1376_v6 = vpop.f32.mrb[124].mxu0  ;;  %v1905_v31 = vpop.f32.mrb[124].mxu1 }
 0x1d5   :  { %v2869_v41 = vpack.c.bf16 %v2170_v43, %v2170_v43  ;;  %v2171_v42 = vmax.f32 %v2122_v5, 0.0  ;;  %v1538_v9 = vmax.f32 %v4986_v8, %v1376_v6  ;;  %v3254_v0 = vpop.f32.mrb[125].mxu0  ;;  %v3358_v19 = vpop.f32.mrb[125].mxu1  ;;  %v4991_v8 = vmax.f32 %v4106_v38, %v4108_v39 }
 0x1d6   :  { %v1379_v22 = vpop.f32.mrb[126].mxu0  ;;  %v1908_v23 = vpop.f32.mrb[126].mxu1  ;;  %v4992_v38 = vmax.f32 %v4118_v52, %v4120_v2 }
 0x1d7   :  { %2417 = vst.msk [vmem:[%s4868_s3 + $0x28] sm:$0xf] %vm2406_vm4, %v2869_v41  ;;  %v2870_v48 = vpack.c.bf16 %v2171_v42, %v2171_v42  ;;  %v2067_v3 = vmax.f32 %v1538_v9, %v1905_v31  ;;  %v1539_v55 = vmax.f32 %v4987_v13, %v1379_v22  ;;  %v3255_v10 = vpop.f32.mrb[127].mxu0  ;;  %v3359_v11 = vpop.f32.mrb[127].mxu1 }
 0x1d9   :  { %2418 = vst.msk [vmem:[%s4868_s3 + $0x2c] sm:$0xf] %vm2406_vm4, %v2870_v48  ;;  %v2123_v16 = vadd.f32 %v4474_v24, %v2067_v3  ;;  %v2068_v20 = vmax.f32 %v1539_v55, %v1908_v23 }
 0x1db   :  { %v2172_v46 = vmax.f32 %v2123_v16, 0.0  ;;  %v2124_v47 = vadd.f32 %v4474_v24, %v2068_v20 }
 0x1dc   :  { %v1384_v29 = vpop.f32.mrb[128].mxu0  ;;  %v1913_v30 = vpop.f32.mrb[128].mxu1 }
 0x1dd   :  { %v2871_v60 = vpack.c.bf16 %v2172_v46, %v2172_v46  ;;  %v2173_v7 = vmax.f32 %v2124_v47, 0.0  ;;  %v1540_v33 = vmax.f32 %v4988_v32, %v1384_v29  ;;  %v3258_v61 = vpop.f32.mrb[129].mxu0  ;;  %v3362_v12 = vpop.f32.mrb[129].mxu1  ;;  %v4993_v29 = vmax.f32 %v4130_v50, %v4132_v51 }
 0x1de   :  { %v1387_v53 = vpop.f32.mrb[130].mxu0  ;;  %v1916_v54 = vpop.f32.mrb[130].mxu1  ;;  %v4994_v50 = vmax.f32 %v4142_v25, %v4144_v26 }
 0x1df   :  { %2419 = vst.msk [vmem:[%s4868_s3 + $0x30] sm:$0xf] %vm2406_vm4, %v2871_v60  ;;  %v2872_v62 = vpack.c.bf16 %v2173_v7, %v2173_v7  ;;  %v2069_v21 = vmax.f32 %v1540_v33, %v1913_v30  ;;  %v1541_v18 = vmax.f32 %v4989_v17, %v1387_v53  ;;  %v3259_v1 = vpop.f32.mrb[131].mxu0  ;;  %v3363_v63 = vpop.f32.mrb[131].mxu1 }
 0x1e1   :  { %2420 = vst.msk [vmem:[%s4868_s3 + $0x34] sm:$0xf] %vm2406_vm4, %v2872_v62  ;;  %v2125_v40 = vadd.f32 %v4474_v24, %v2069_v21  ;;  %v2070_v44 = vmax.f32 %v1541_v18, %v1916_v54 }
 0x1e3   :  { %v2174_v34 = vmax.f32 %v2125_v40, 0.0  ;;  %v2126_v35 = vadd.f32 %v4474_v24, %v2070_v44  ;;  %v4995_v40 = vmax.f32 %v4154_v28, %v4156_v45  ;;  %v4996_v45 = vmax.f32 %v4166_v49, %v4168_v15 }
 0x1e4   :  { %v1392_v36 = vpop.f32.mrb[132].mxu0  ;;  %v1921_v37 = vpop.f32.mrb[132].mxu1 }
 0x1e5   :  { %v2873_v58 = vpack.c.bf16 %v2174_v34, %v2174_v34  ;;  %v2175_v59 = vmax.f32 %v2126_v35, 0.0  ;;  %v1542_v57 = vmax.f32 %v4990_v56, %v1392_v36  ;;  %v3262_v43 = vpop.f32.mrb[133].mxu0  ;;  %v3366_v5 = vpop.f32.mrb[133].mxu1 }
 0x1e6   :  { %v1395_v6 = vpop.f32.mrb[134].mxu0  ;;  %v1924_v31 = vpop.f32.mrb[134].mxu1 }
 0x1e7   :  { %2421 = vst.msk [vmem:[%s4868_s3 + $0x38] sm:$0xf] %vm2406_vm4, %v2873_v58  ;;  %v2874_v41 = vpack.c.bf16 %v2175_v59, %v2175_v59  ;;  %v2071_v42 = vmax.f32 %v1542_v57, %v1921_v37  ;;  %v1543_v9 = vmax.f32 %v4991_v8, %v1395_v6  ;;  %v3263_v0 = vpop.f32.mrb[135].mxu0  ;;  %v3367_v19 = vpop.f32.mrb[135].mxu1  ;;  %v4997_v8 = vld [vmem:[#allocation2_spill] sm:$0xff] }
 0x1e9   :  { %2422 = vst.msk [vmem:[%s4868_s3 + $0x3c] sm:$0xf] %vm2406_vm4, %v2874_v41  ;;  %v2127_v4 = vadd.f32 %v4474_v24, %v2071_v42  ;;  %v2072_v14 = vmax.f32 %v1543_v9, %v1924_v31  ;;  %v4998_v9 = vmax.f32 %v4178_v27, %v4997_v8  ;;  %v5000_v27 = vld [vmem:[#allocation4_spill] sm:$0xff] }
 0x1eb   :  { %v2176_v22 = vmax.f32 %v2127_v4, 0.0  ;;  %v2128_v23 = vadd.f32 %v4474_v24, %v2072_v14 }
 0x1ec   :  { %v1400_v48 = vpop.f32.mrb[136].mxu0  ;;  %v1929_v3 = vpop.f32.mrb[136].mxu1 }
 0x1ed   :  { %v2875_v13 = vpack.c.bf16 %v2176_v22, %v2176_v22  ;;  %v2177_v55 = vmax.f32 %v2128_v23, 0.0  ;;  %v1544_v39 = vmax.f32 %v4992_v38, %v1400_v48  ;;  %v3266_v10 = vpop.f32.mrb[137].mxu0  ;;  %v3370_v11 = vpop.f32.mrb[137].mxu1 }
 0x1ee   :  { %v1403_v16 = vpop.f32.mrb[138].mxu0  ;;  %v1932_v20 = vpop.f32.mrb[138].mxu1 }
 0x1ef   :  { %2423 = vst.msk [vmem:[%s4868_s3 + $0x40] sm:$0xf] %vm2406_vm4, %v2875_v13  ;;  %v2876_v46 = vpack.c.bf16 %v2177_v55, %v2177_v55  ;;  %v2073_v47 = vmax.f32 %v1544_v39, %v1929_v3  ;;  %v1545_v30 = vmax.f32 %v4993_v29, %v1403_v16  ;;  %v3267_v60 = vpop.f32.mrb[139].mxu0  ;;  %v3371_v7 = vpop.f32.mrb[139].mxu1  ;;  %v4999_v55 = vld [vmem:[#allocation3_spill] sm:$0xff]  ;;  %v5002_v29 = vld [vmem:[#allocation5_spill] sm:$0xff] }
 0x1f0   :  { %v5001_v38 = vmax.f32 %v4999_v55, %v5000_v27 }
 0x1f1   :  { %2424 = vst.msk [vmem:[%s4868_s3 + $0x44] sm:$0xf] %vm2406_vm4, %v2876_v46  ;;  %v2129_v52 = vadd.f32 %v4474_v24, %v2073_v47  ;;  %v2074_v2 = vmax.f32 %v1545_v30, %v1932_v20  ;;  %v5003_v30 = vld [vmem:[#allocation6_spill] sm:$0xff] }
 0x1f2   :  { %v5004_v60 = vmax.f32 %v5002_v29, %v5003_v30  ;;  %v5018_v29 = vld [vmem:[#allocation16_spill] sm:$0xff] }
 0x1f3   :  { %v2178_v32 = vmax.f32 %v2129_v52, 0.0  ;;  %v2130_v33 = vadd.f32 %v4474_v24, %v2074_v2 }
 0x1f4   :  { %v1408_v61 = vpop.f32.mrb[140].mxu0  ;;  %v1937_v12 = vpop.f32.mrb[140].mxu1 }
 0x1f5   :  { %v2877_v53 = vpack.c.bf16 %v2178_v32, %v2178_v32  ;;  %v2179_v54 = vmax.f32 %v2130_v33, 0.0  ;;  %v1546_v51 = vmax.f32 %v4994_v50, %v1408_v61  ;;  %v3270_v62 = vpop.f32.mrb[141].mxu0  ;;  %v3374_v21 = vpop.f32.mrb[141].mxu1 }
 0x1f6   :  { %v1411_v17 = vpop.f32.mrb[142].mxu0  ;;  %v1940_v18 = vpop.f32.mrb[142].mxu1  ;;  %v5005_v62 = vld [vmem:[#allocation7_spill] sm:$0xff]  ;;  %v5006_v21 = vld [vmem:[#allocation8_spill] sm:$0xff] }
 0x1f7   :  { %2425 = vst.msk [vmem:[%s4868_s3 + $0x48] sm:$0xf] %vm2406_vm4, %v2877_v53  ;;  %v2878_v1 = vpack.c.bf16 %v2179_v54, %v2179_v54  ;;  %v2075_v63 = vmax.f32 %v1546_v51, %v1937_v12  ;;  %v1547_v44 = vmax.f32 %v4995_v40, %v1411_v17  ;;  %v3271_v34 = vpop.f32.mrb[143].mxu0  ;;  %v3375_v35 = vpop.f32.mrb[143].mxu1  ;;  %v5007_v17 = vmax.f32 %v5005_v62, %v5006_v21 }
 0x1f9   :  { %2426 = vst.msk [vmem:[%s4868_s3 + $0x4c] sm:$0xf] %vm2406_vm4, %v2878_v1  ;;  %v2131_v25 = vadd.f32 %v4474_v24, %v2075_v63  ;;  %v2076_v26 = vmax.f32 %v1547_v44, %v1940_v18 }
 0x1fb   :  { %v2180_v36 = vmax.f32 %v2131_v25, 0.0  ;;  %v2132_v37 = vadd.f32 %v4474_v24, %v2076_v26  ;;  %v5008_v25 = vld [vmem:[#allocation9_spill] sm:$0xff]  ;;  %v5009_v26 = vld [vmem:[#allocation10_spill] sm:$0xff] }
 0x1fc   :  { %v1416_v58 = vpop.f32.mrb[144].mxu0  ;;  %v1945_v59 = vpop.f32.mrb[144].mxu1 }
 0x1fd   :  { %v2879_v56 = vpack.c.bf16 %v2180_v36, %v2180_v36  ;;  %v2181_v57 = vmax.f32 %v2132_v37, 0.0  ;;  %v1548_v28 = vmax.f32 %v4996_v45, %v1416_v58  ;;  %v3274_v43 = vpop.f32.mrb[145].mxu0  ;;  %v3378_v5 = vpop.f32.mrb[145].mxu1  ;;  %v5010_v36 = vmax.f32 %v5008_v25, %v5009_v26  ;;  %v5024_v25 = vld [vmem:[#allocation20_spill] sm:$0xff] }
 0x1fe   :  { %v1419_v6 = vpop.f32.mrb[146].mxu0  ;;  %v1948_v31 = vpop.f32.mrb[146].mxu1 }
 0x1ff   :  { %2427 = vst.msk [vmem:[%s4868_s3 + $0x50] sm:$0xf] %vm2406_vm4, %v2879_v56  ;;  %v2880_v41 = vpack.c.bf16 %v2181_v57, %v2181_v57  ;;  %v2077_v42 = vmax.f32 %v1548_v28, %v1945_v59  ;;  %v1549_v0 = vmax.f32 %v4998_v9, %v1419_v6  ;;  %v3275_v19 = vpop.f32.mrb[147].mxu0  ;;  %v3379_v4 = vpop.f32.mrb[147].mxu1 }
 0x201   :  { %2428 = vst.msk [vmem:[%s4868_s3 + $0x54] sm:$0xf] %vm2406_vm4, %v2880_v41  ;;  %v2133_v49 = vadd.f32 %v4474_v24, %v2077_v42  ;;  %v2078_v15 = vmax.f32 %v1549_v0, %v1948_v31  ;;  %v5011_v41 = vld [vmem:[#allocation11_spill] sm:$0xff]  ;;  %v5012_v42 = vld [vmem:[#allocation12_spill] sm:$0xff] }
 0x202   :  { %v5013_v8 = vmax.f32 %v5011_v41, %v5012_v42 }
 0x203   :  { %v2182_v14 = vmax.f32 %v2133_v49, 0.0  ;;  %v2134_v22 = vadd.f32 %v4474_v24, %v2078_v15 }
 0x204   :  { %v1424_v23 = vpop.f32.mrb[148].mxu0  ;;  %v1953_v48 = vpop.f32.mrb[148].mxu1 }
 0x205   :  { %v2881_v3 = vpack.c.bf16 %v2182_v14, %v2182_v14  ;;  %v2183_v13 = vmax.f32 %v2134_v22, 0.0  ;;  %v1550_v39 = vmax.f32 %v5001_v38, %v1424_v23  ;;  %v3278_v10 = vpop.f32.mrb[149].mxu0  ;;  %v3382_v11 = vpop.f32.mrb[149].mxu1  ;;  %v5014_v22 = vld [vmem:[#allocation13_spill] sm:$0xff]  ;;  %v5015_v23 = vld [vmem:[#allocation14_spill] sm:$0xff] }
 0x206   :  { %v1427_v16 = vpop.f32.mrb[150].mxu0  ;;  %v1956_v20 = vpop.f32.mrb[150].mxu1 }
 0x207   :  { %2429 = vst.msk [vmem:[%s4868_s3 + $0x58] sm:$0xf] %vm2406_vm4, %v2881_v3  ;;  %v2882_v46 = vpack.c.bf16 %v2183_v13, %v2183_v13  ;;  %v2079_v47 = vmax.f32 %v1550_v39, %v1953_v48  ;;  %v1551_v7 = vmax.f32 %v5004_v60, %v1427_v16  ;;  %v3279_v52 = vpop.f32.mrb[151].mxu0  ;;  %v3383_v2 = vpop.f32.mrb[151].mxu1  ;;  %v5016_v48 = vmax.f32 %v5014_v22, %v5015_v23  ;;  %v5030_v22 = vld [vmem:[#allocation24_spill] sm:$0xff] }
 0x209   :  { %2430 = vst.msk [vmem:[%s4868_s3 + $0x5c] sm:$0xf] %vm2406_vm4, %v2882_v46  ;;  %v2135_v32 = vadd.f32 %v4474_v24, %v2079_v47  ;;  %v2080_v33 = vmax.f32 %v1551_v7, %v1956_v20  ;;  %v5017_v47 = vld [vmem:[#allocation15_spill] sm:$0xff] }
 0x20a   :  { %v5019_v30 = vmax.f32 %v5017_v47, %v5018_v29 }
 0x20b   :  { %v2184_v61 = vmax.f32 %v2135_v32, 0.0  ;;  %v2136_v12 = vadd.f32 %v4474_v24, %v2080_v33 }
 0x20c   :  { %v1432_v53 = vpop.f32.mrb[152].mxu0  ;;  %v1961_v54 = vpop.f32.mrb[152].mxu1 }
 0x20d   :  { %v2883_v50 = vpack.c.bf16 %v2184_v61, %v2184_v61  ;;  %v2185_v51 = vmax.f32 %v2136_v12, 0.0  ;;  %v1552_v18 = vmax.f32 %v5007_v17, %v1432_v53  ;;  %v3282_v1 = vpop.f32.mrb[153].mxu0  ;;  %v3386_v63 = vpop.f32.mrb[153].mxu1  ;;  %v5020_v12 = vld [vmem:[#allocation17_spill] sm:$0xff]  ;;  %v5021_v53 = vld [vmem:[#allocation18_spill] sm:$0xff] }
 0x20e   :  { %v1435_v40 = vpop.f32.mrb[154].mxu0  ;;  %v1964_v44 = vpop.f32.mrb[154].mxu1 }
 0x20f   :  { %2431 = vst.msk [vmem:[%s4868_s3 + $0x60] sm:$0xf] %vm2406_vm4, %v2883_v50  ;;  %v2884_v34 = vpack.c.bf16 %v2185_v51, %v2185_v51  ;;  %v2081_v35 = vmax.f32 %v1552_v18, %v1961_v54  ;;  %v1553_v37 = vmax.f32 %v5010_v36, %v1435_v40  ;;  %v3283_v58 = vpop.f32.mrb[155].mxu0  ;;  %v3387_v59 = vpop.f32.mrb[155].mxu1  ;;  %v5022_v54 = vmax.f32 %v5020_v12, %v5021_v53  ;;  %v5036_v12 = vld [vmem:[#allocation28_spill] sm:$0xff] }
 0x211   :  { %2432 = vst.msk [vmem:[%s4868_s3 + $0x64] sm:$0xf] %vm2406_vm4, %v2884_v34  ;;  %v2137_v56 = vadd.f32 %v4474_v24, %v2081_v35  ;;  %v2082_v57 = vmax.f32 %v1553_v37, %v1964_v44  ;;  %v5023_v35 = vld [vmem:[#allocation19_spill] sm:$0xff] }
 0x212   :  { %v5025_v26 = vmax.f32 %v5023_v35, %v5024_v25 }
 0x213   :  { %v2186_v45 = vmax.f32 %v2137_v56, 0.0  ;;  %v2138_v28 = vadd.f32 %v4474_v24, %v2082_v57 }
 0x214   :  { %v1440_v43 = vpop.f32.mrb[156].mxu0  ;;  %v1969_v5 = vpop.f32.mrb[156].mxu1 }
 0x215   :  { %v2885_v6 = vpack.c.bf16 %v2186_v45, %v2186_v45  ;;  %v2187_v31 = vmax.f32 %v2138_v28, 0.0  ;;  %v1554_v9 = vmax.f32 %v5013_v8, %v1440_v43  ;;  %v3286_v0 = vpop.f32.mrb[157].mxu0  ;;  %v3390_v19 = vpop.f32.mrb[157].mxu1  ;;  %v5026_v28 = vld [vmem:[#allocation21_spill] sm:$0xff]  ;;  %v5027_v43 = vld [vmem:[#allocation22_spill] sm:$0xff] }
 0x216   :  { %v1443_v4 = vpop.f32.mrb[158].mxu0  ;;  %v1972_v49 = vpop.f32.mrb[158].mxu1 }
 0x217   :  { %2433 = vst.msk [vmem:[%s4868_s3 + $0x68] sm:$0xf] %vm2406_vm4, %v2885_v6  ;;  %v2886_v15 = vpack.c.bf16 %v2187_v31, %v2187_v31  ;;  %v2083_v14 = vmax.f32 %v1554_v9, %v1969_v5  ;;  %v1555_v3 = vmax.f32 %v5016_v48, %v1443_v4  ;;  %v3287_v13 = vpop.f32.mrb[159].mxu0  ;;  %v3391_v55 = vpop.f32.mrb[159].mxu1  ;;  %v5028_v5 = vmax.f32 %v5026_v28, %v5027_v43  ;;  %v5042_v28 = vld [vmem:[#allocation32_spill] sm:$0xff] }
 0x219   :  { %2434 = vst.msk [vmem:[%s4868_s3 + $0x6c] sm:$0xf] %vm2406_vm4, %v2886_v15  ;;  %v2139_v27 = vadd.f32 %v4474_v24, %v2083_v14  ;;  %v2084_v38 = vmax.f32 %v1555_v3, %v1972_v49  ;;  %v5029_v14 = vld [vmem:[#allocation23_spill] sm:$0xff] }
 0x21a   :  { %v5031_v23 = vmax.f32 %v5029_v14, %v5030_v22 }
 0x21b   :  { %v2188_v39 = vmax.f32 %v2139_v27, 0.0  ;;  %v2140_v10 = vadd.f32 %v4474_v24, %v2084_v38 }
 0x21c   :  { %v1448_v11 = vpop.f32.mrb[160].mxu0  ;;  %v1977_v16 = vpop.f32.mrb[160].mxu1 }
 0x21d   :  { %v2887_v20 = vpack.c.bf16 %v2188_v39, %v2188_v39  ;;  %v2189_v46 = vmax.f32 %v2140_v10, 0.0  ;;  %v1556_v60 = vmax.f32 %v5019_v30, %v1448_v11  ;;  %v3290_v7 = vpop.f32.mrb[161].mxu0  ;;  %v3394_v52 = vpop.f32.mrb[161].mxu1  ;;  %v5032_v10 = vld [vmem:[#allocation25_spill] sm:$0xff]  ;;  %v5033_v11 = vld [vmem:[#allocation26_spill] sm:$0xff] }
 0x21e   :  { %v1451_v2 = vpop.f32.mrb[162].mxu0  ;;  %v1980_v32 = vpop.f32.mrb[162].mxu1 }
 0x21f   :  { %2435 = vst.msk [vmem:[%s4868_s3 + $0x70] sm:$0xf] %vm2406_vm4, %v2887_v20  ;;  %v2888_v33 = vpack.c.bf16 %v2189_v46, %v2189_v46  ;;  %v2085_v61 = vmax.f32 %v1556_v60, %v1977_v16  ;;  %v1557_v50 = vmax.f32 %v5022_v54, %v1451_v2  ;;  %v3291_v51 = vpop.f32.mrb[163].mxu0  ;;  %v3395_v62 = vpop.f32.mrb[163].mxu1  ;;  %v5034_v16 = vmax.f32 %v5032_v10, %v5033_v11  ;;  %v5048_v10 = vld [vmem:[#allocation36_spill] sm:$0xff] }
 0x221   :  { %2436 = vst.msk [vmem:[%s4868_s3 + $0x74] sm:$0xf] %vm2406_vm4, %v2888_v33  ;;  %v2141_v21 = vadd.f32 %v4474_v24, %v2085_v61  ;;  %v2086_v17 = vmax.f32 %v1557_v50, %v1980_v32  ;;  %v5035_v61 = vld [vmem:[#allocation27_spill] sm:$0xff] }
 0x222   :  { %v5037_v53 = vmax.f32 %v5035_v61, %v5036_v12 }
 0x223   :  { %v2190_v18 = vmax.f32 %v2141_v21, 0.0  ;;  %v2142_v1 = vadd.f32 %v4474_v24, %v2086_v17 }
 0x224   :  { %v1456_v63 = vpop.f32.mrb[164].mxu0  ;;  %v1985_v40 = vpop.f32.mrb[164].mxu1 }
 0x225   :  { %v2889_v44 = vpack.c.bf16 %v2190_v18, %v2190_v18  ;;  %v2191_v34 = vmax.f32 %v2142_v1, 0.0  ;;  %v1558_v36 = vmax.f32 %v5025_v26, %v1456_v63  ;;  %v3294_v37 = vpop.f32.mrb[165].mxu0  ;;  %v3398_v58 = vpop.f32.mrb[165].mxu1  ;;  %v5038_v1 = vld [vmem:[#allocation29_spill] sm:$0xff]  ;;  %v5039_v63 = vld [vmem:[#allocation30_spill] sm:$0xff] }
 0x226   :  { %v1459_v59 = vpop.f32.mrb[166].mxu0  ;;  %v1988_v56 = vpop.f32.mrb[166].mxu1 }
 0x227   :  { %2437 = vst.msk [vmem:[%s4868_s3 + $0x78] sm:$0xf] %vm2406_vm4, %v2889_v44  ;;  %v2890_v57 = vpack.c.bf16 %v2191_v34, %v2191_v34  ;;  %v2087_v45 = vmax.f32 %v1558_v36, %v1985_v40  ;;  %v1559_v6 = vmax.f32 %v5028_v5, %v1459_v59  ;;  %v3295_v31 = vpop.f32.mrb[167].mxu0  ;;  %v3399_v41 = vpop.f32.mrb[167].mxu1  ;;  %v5040_v40 = vmax.f32 %v5038_v1, %v5039_v63  ;;  %v5054_v1 = vld [vmem:[#allocation40_spill] sm:$0xff] }
 0x229   :  { %2438 = vst.msk [vmem:[%s4868_s3 + $0x7c] sm:$0xf] %vm2406_vm4, %v2890_v57  ;;  %v2143_v42 = vadd.f32 %v4474_v24, %v2087_v45  ;;  %v2088_v8 = vmax.f32 %v1559_v6, %v1988_v56  ;;  %v5041_v45 = vld [vmem:[#allocation31_spill] sm:$0xff] }
 0x22a   :  { %v5043_v43 = vmax.f32 %v5041_v45, %v5042_v28 }
 0x22b   :  { %v2192_v9 = vmax.f32 %v2143_v42, 0.0  ;;  %v2144_v0 = vadd.f32 %v4474_v24, %v2088_v8 }
 0x22c   :  { %v1464_v19 = vpop.f32.mrb[168].mxu0  ;;  %v1993_v4 = vpop.f32.mrb[168].mxu1 }
 0x22d   :  { %v2891_v49 = vpack.c.bf16 %v2192_v9, %v2192_v9  ;;  %v2193_v15 = vmax.f32 %v2144_v0, 0.0  ;;  %v1560_v48 = vmax.f32 %v5031_v23, %v1464_v19  ;;  %v3298_v3 = vpop.f32.mrb[169].mxu0  ;;  %v3402_v13 = vpop.f32.mrb[169].mxu1  ;;  %v5044_v0 = vld [vmem:[#allocation33_spill] sm:$0xff]  ;;  %v5045_v19 = vld [vmem:[#allocation34_spill] sm:$0xff] }
 0x22e   :  { %v1467_v55 = vpop.f32.mrb[170].mxu0  ;;  %v1996_v27 = vpop.f32.mrb[170].mxu1 }
 0x22f   :  { %2439 = vst.msk [vmem:[%s4868_s3 + $0x80] sm:$0xf] %vm2406_vm4, %v2891_v49  ;;  %v2892_v38 = vpack.c.bf16 %v2193_v15, %v2193_v15  ;;  %v2089_v39 = vmax.f32 %v1560_v48, %v1993_v4  ;;  %v1561_v20 = vmax.f32 %v5034_v16, %v1467_v55  ;;  %v3299_v46 = vpop.f32.mrb[171].mxu0  ;;  %v3403_v47 = vpop.f32.mrb[171].mxu1  ;;  %v5046_v4 = vmax.f32 %v5044_v0, %v5045_v19  ;;  %v5060_v0 = vld [vmem:[#allocation44_spill] sm:$0xff] }
 0x231   :  { %2440 = vst.msk [vmem:[%s4868_s3 + $0x84] sm:$0xf] %vm2406_vm4, %v2892_v38  ;;  %v2145_v29 = vadd.f32 %v4474_v24, %v2089_v39  ;;  %v2090_v30 = vmax.f32 %v1561_v20, %v1996_v27  ;;  %v5047_v39 = vld [vmem:[#allocation35_spill] sm:$0xff] }
 0x232   :  { %v5049_v11 = vmax.f32 %v5047_v39, %v5048_v10 }
 0x233   :  { %v2194_v60 = vmax.f32 %v2145_v29, 0.0  ;;  %v2146_v7 = vadd.f32 %v4474_v24, %v2090_v30 }
 0x234   :  { %v1472_v52 = vpop.f32.mrb[172].mxu0  ;;  %v2001_v2 = vpop.f32.mrb[172].mxu1 }
 0x235   :  { %v2893_v32 = vpack.c.bf16 %v2194_v60, %v2194_v60  ;;  %v2195_v33 = vmax.f32 %v2146_v7, 0.0  ;;  %v1562_v54 = vmax.f32 %v5037_v53, %v1472_v52  ;;  %v3302_v50 = vpop.f32.mrb[173].mxu0  ;;  %v3406_v51 = vpop.f32.mrb[173].mxu1  ;;  %v5050_v7 = vld [vmem:[#allocation37_spill] sm:$0xff]  ;;  %v5051_v52 = vld [vmem:[#allocation38_spill] sm:$0xff] }
 0x236   :  { %v1475_v62 = vpop.f32.mrb[174].mxu0  ;;  %v2004_v21 = vpop.f32.mrb[174].mxu1 }
 0x237   :  { %2441 = vst.msk [vmem:[%s4868_s3 + $0x88] sm:$0xf] %vm2406_vm4, %v2893_v32  ;;  %v2894_v17 = vpack.c.bf16 %v2195_v33, %v2195_v33  ;;  %v2091_v18 = vmax.f32 %v1562_v54, %v2001_v2  ;;  %v1563_v44 = vmax.f32 %v5040_v40, %v1475_v62  ;;  %v3303_v34 = vpop.f32.mrb[175].mxu0  ;;  %v3407_v35 = vpop.f32.mrb[175].mxu1  ;;  %v5052_v2 = vmax.f32 %v5050_v7, %v5051_v52  ;;  %v5066_v7 = vld [vmem:[#allocation48_spill] sm:$0xff] }
 0x239   :  { %2442 = vst.msk [vmem:[%s4868_s3 + $0x8c] sm:$0xf] %vm2406_vm4, %v2894_v17  ;;  %v2147_v25 = vadd.f32 %v4474_v24, %v2091_v18  ;;  %v2092_v26 = vmax.f32 %v1563_v44, %v2004_v21  ;;  %v5053_v18 = vld [vmem:[#allocation39_spill] sm:$0xff] }
 0x23a   :  { %v5055_v63 = vmax.f32 %v5053_v18, %v5054_v1 }
 0x23b   :  { %v2196_v36 = vmax.f32 %v2147_v25, 0.0  ;;  %v2148_v37 = vadd.f32 %v4474_v24, %v2092_v26 }
 0x23c   :  { %v1480_v58 = vpop.f32.mrb[176].mxu0  ;;  %v2009_v59 = vpop.f32.mrb[176].mxu1 }
 0x23d   :  { %v2895_v56 = vpack.c.bf16 %v2196_v36, %v2196_v36  ;;  %v2197_v57 = vmax.f32 %v2148_v37, 0.0  ;;  %v1564_v5 = vmax.f32 %v5043_v43, %v1480_v58  ;;  %v3306_v6 = vpop.f32.mrb[177].mxu0  ;;  %v3410_v31 = vpop.f32.mrb[177].mxu1  ;;  %v5056_v37 = vld [vmem:[#allocation41_spill] sm:$0xff]  ;;  %v5057_v58 = vld [vmem:[#allocation42_spill] sm:$0xff] }
 0x23e   :  { %v1483_v41 = vpop.f32.mrb[178].mxu0  ;;  %v2012_v42 = vpop.f32.mrb[178].mxu1 }
 0x23f   :  { %2443 = vst.msk [vmem:[%s4868_s3 + $0x90] sm:$0xf] %vm2406_vm4, %v2895_v56  ;;  %v2896_v8 = vpack.c.bf16 %v2197_v57, %v2197_v57  ;;  %v2093_v9 = vmax.f32 %v1564_v5, %v2009_v59  ;;  %v1565_v49 = vmax.f32 %v5046_v4, %v1483_v41  ;;  %v3307_v15 = vpop.f32.mrb[179].mxu0  ;;  %v3411_v14 = vpop.f32.mrb[179].mxu1  ;;  %v5058_v59 = vmax.f32 %v5056_v37, %v5057_v58  ;;  %v5072_v37 = vld [vmem:[#allocation52_spill] sm:$0xff] }
 0x241   :  { %2444 = vst.msk [vmem:[%s4868_s3 + $0x94] sm:$0xf] %vm2406_vm4, %v2896_v8  ;;  %v2149_v22 = vadd.f32 %v4474_v24, %v2093_v9  ;;  %v2094_v23 = vmax.f32 %v1565_v49, %v2012_v42  ;;  %v5059_v9 = vld [vmem:[#allocation43_spill] sm:$0xff] }
 0x242   :  { %v5061_v19 = vmax.f32 %v5059_v9, %v5060_v0 }
 0x243   :  { %v2198_v48 = vmax.f32 %v2149_v22, 0.0  ;;  %v2150_v3 = vadd.f32 %v4474_v24, %v2094_v23 }
 0x244   :  { %v1488_v13 = vpop.f32.mrb[180].mxu0  ;;  %v2017_v55 = vpop.f32.mrb[180].mxu1 }
 0x245   :  { %v2897_v27 = vpack.c.bf16 %v2198_v48, %v2198_v48  ;;  %v2199_v38 = vmax.f32 %v2150_v3, 0.0  ;;  %v1566_v16 = vmax.f32 %v5049_v11, %v1488_v13  ;;  %v3310_v20 = vpop.f32.mrb[181].mxu0  ;;  %v3414_v46 = vpop.f32.mrb[181].mxu1  ;;  %v5062_v3 = vld [vmem:[#allocation45_spill] sm:$0xff]  ;;  %v5063_v13 = vld [vmem:[#allocation46_spill] sm:$0xff] }
 0x246   :  { %v1491_v47 = vpop.f32.mrb[182].mxu0  ;;  %v2020_v29 = vpop.f32.mrb[182].mxu1 }
 0x247   :  { %2445 = vst.msk [vmem:[%s4868_s3 + $0x98] sm:$0xf] %vm2406_vm4, %v2897_v27  ;;  %v2898_v30 = vpack.c.bf16 %v2199_v38, %v2199_v38  ;;  %v2095_v60 = vmax.f32 %v1566_v16, %v2017_v55  ;;  %v1567_v32 = vmax.f32 %v5052_v2, %v1491_v47  ;;  %v3311_v33 = vpop.f32.mrb[183].mxu0  ;;  %v3415_v61 = vpop.f32.mrb[183].mxu1  ;;  %v5064_v55 = vmax.f32 %v5062_v3, %v5063_v13 }
 0x249   :  { %2446 = vst.msk [vmem:[%s4868_s3 + $0x9c] sm:$0xf] %vm2406_vm4, %v2898_v30  ;;  %v2151_v12 = vadd.f32 %v4474_v24, %v2095_v60  ;;  %v2096_v53 = vmax.f32 %v1567_v32, %v2020_v29  ;;  %v5065_v60 = vld [vmem:[#allocation47_spill] sm:$0xff] }
 0x24a   :  { %v5067_v52 = vmax.f32 %v5065_v60, %v5066_v7 }
 0x24b   :  { %v2200_v54 = vmax.f32 %v2151_v12, 0.0  ;;  %v2152_v50 = vadd.f32 %v4474_v24, %v2096_v53 }
 0x24c   :  { %v1496_v51 = vpop.f32.mrb[184].mxu0  ;;  %v2025_v62 = vpop.f32.mrb[184].mxu1 }
 0x24d   :  { %v2899_v21 = vpack.c.bf16 %v2200_v54, %v2200_v54  ;;  %v2201_v17 = vmax.f32 %v2152_v50, 0.0  ;;  %v1568_v40 = vmax.f32 %v5055_v63, %v1496_v51  ;;  %v3314_v44 = vpop.f32.mrb[185].mxu0  ;;  %v3418_v34 = vpop.f32.mrb[185].mxu1  ;;  %v5068_v50 = vld [vmem:[#allocation49_spill] sm:$0xff]  ;;  %v5069_v51 = vld [vmem:[#allocation50_spill] sm:$0xff] }
 0x24e   :  { %v1499_v35 = vpop.f32.mrb[186].mxu0  ;;  %v2028_v25 = vpop.f32.mrb[186].mxu1 }
 0x24f   :  { %2447 = vst.msk [vmem:[%s4868_s3 + $0xa0] sm:$0xf] %vm2406_vm4, %v2899_v21  ;;  %v2900_v26 = vpack.c.bf16 %v2201_v17, %v2201_v17  ;;  %v2097_v36 = vmax.f32 %v1568_v40, %v2025_v62  ;;  %v1569_v56 = vmax.f32 %v5058_v59, %v1499_v35  ;;  %v3315_v57 = vpop.f32.mrb[187].mxu0  ;;  %v3419_v45 = vpop.f32.mrb[187].mxu1  ;;  %v5070_v62 = vmax.f32 %v5068_v50, %v5069_v51 }
 0x251   :  { %2448 = vst.msk [vmem:[%s4868_s3 + $0xa4] sm:$0xf] %vm2406_vm4, %v2900_v26  ;;  %v2153_v28 = vadd.f32 %v4474_v24, %v2097_v36  ;;  %v2098_v43 = vmax.f32 %v1569_v56, %v2028_v25  ;;  %v5071_v36 = vld [vmem:[#allocation51_spill] sm:$0xff] }
 0x252   :  { %v5073_v58 = vmax.f32 %v5071_v36, %v5072_v37 }
 0x253   :  { %v2202_v5 = vmax.f32 %v2153_v28, 0.0  ;;  %v2154_v6 = vadd.f32 %v4474_v24, %v2098_v43 }
 0x254   :  { %v1504_v31 = vpop.f32.mrb[188].mxu0  ;;  %v2033_v41 = vpop.f32.mrb[188].mxu1 }
 0x255   :  { %v2901_v42 = vpack.c.bf16 %v2202_v5, %v2202_v5  ;;  %v2203_v8 = vmax.f32 %v2154_v6, 0.0  ;;  %v1570_v4 = vmax.f32 %v5061_v19, %v1504_v31  ;;  %v3318_v49 = vpop.f32.mrb[189].mxu0  ;;  %v3422_v15 = vpop.f32.mrb[189].mxu1 }
 0x256   :  { %v1507_v14 = vpop.f32.mrb[190].mxu0  ;;  %v2036_v22 = vpop.f32.mrb[190].mxu1 }
 0x257   :  { %2449 = vst.msk [vmem:[%s4868_s3 + $0xa8] sm:$0xf] %vm2406_vm4, %v2901_v42  ;;  %v2902_v23 = vpack.c.bf16 %v2203_v8, %v2203_v8  ;;  %v2099_v48 = vmax.f32 %v1570_v4, %v2033_v41  ;;  %v1571_v27 = vmax.f32 %v5064_v55, %v1507_v14  ;;  %v3319_v38 = vpop.f32.mrb[191].mxu0  ;;  %v3423_v39 = vpop.f32.mrb[191].mxu1 }
 0x259   :  { %2450 = vst.msk [vmem:[%s4868_s3 + $0xac] sm:$0xf] %vm2406_vm4, %v2902_v23  ;;  %v2155_v10 = vadd.f32 %v4474_v24, %v2099_v48  ;;  %v2100_v11 = vmax.f32 %v1571_v27, %v2036_v22 }
 0x25b   :  { %v2204_v16 = vmax.f32 %v2155_v10, 0.0  ;;  %v2156_v20 = vadd.f32 %v4474_v24, %v2100_v11 }
 0x25c   :  { %v1512_v46 = vpop.f32.mrb[192].mxu0  ;;  %v2041_v47 = vpop.f32.mrb[192].mxu1 }
 0x25d   :  { %v2903_v29 = vpack.c.bf16 %v2204_v16, %v2204_v16  ;;  %v2205_v30 = vmax.f32 %v2156_v20, 0.0  ;;  %v1572_v2 = vmax.f32 %v5067_v52, %v1512_v46  ;;  %v3322_v32 = vpop.f32.mrb[193].mxu0  ;;  %v3426_v33 = vpop.f32.mrb[193].mxu1 }
 0x25e   :  { %v1515_v61 = vpop.f32.mrb[194].mxu0  ;;  %v2044_v12 = vpop.f32.mrb[194].mxu1 }
 0x25f   :  { %2451 = vst.msk [vmem:[%s4868_s3 + $0xb0] sm:$0xf] %vm2406_vm4, %v2903_v29  ;;  %v2904_v53 = vpack.c.bf16 %v2205_v30, %v2205_v30  ;;  %v2101_v54 = vmax.f32 %v1572_v2, %v2041_v47  ;;  %v1573_v21 = vmax.f32 %v5070_v62, %v1515_v61  ;;  %v3323_v17 = vpop.f32.mrb[195].mxu0  ;;  %v3427_v18 = vpop.f32.mrb[195].mxu1 }
 0x261   :  { %2452 = vst.msk [vmem:[%s4868_s3 + $0xb4] sm:$0xf] %vm2406_vm4, %v2904_v53  ;;  %v2157_v1 = vadd.f32 %v4474_v24, %v2101_v54  ;;  %v2102_v63 = vmax.f32 %v1573_v21, %v2044_v12 }
 0x263   :  { %v2206_v40 = vmax.f32 %v2157_v1, 0.0  ;;  %v2158_v44 = vadd.f32 %v4474_v24, %v2102_v63 }
 0x264   :  { %v1520_v34 = vpop.f32.mrb[196].mxu0  ;;  %v2049_v35 = vpop.f32.mrb[196].mxu1 }
 0x265   :  { %v2905_v25 = vpack.c.bf16 %v2206_v40, %v2206_v40  ;;  %v2207_v26 = vmax.f32 %v2158_v44, 0.0  ;;  %v1574_v59 = vmax.f32 %v5073_v58, %v1520_v34  ;;  %v3326_v56 = vpop.f32.mrb[197].mxu0  ;;  %v3430_v57 = vpop.f32.mrb[197].mxu1 }
 0x266   :  { %v1523_v45 = vpop.f32.mrb[198].mxu0  ;;  %v2052_v28 = vpop.f32.mrb[198].mxu1 }
 0x267   :  { %2453 = vst.msk [vmem:[%s4868_s3 + $0xb8] sm:$0xf] %vm2406_vm4, %v2905_v25  ;;  %v2906_v43 = vpack.c.bf16 %v2207_v26, %v2207_v26  ;;  %v2103_v5 = vmax.f32 %v1574_v59, %v2049_v35  ;;  %v3327_v6 = vpop.f32.mrb[199].mxu0  ;;  %v3431_v31 = vpop.f32.mrb[199].mxu1 }
 0x269   :  { %2454 = vst.msk [vmem:[%s4868_s3 + $0xbc] sm:$0xf] %vm2406_vm4, %v2906_v43  ;;  %v2159_v41 = vadd.f32 %v4474_v24, %v2103_v5 }
 0x26b   :  { %v2208_v42 = vmax.f32 %v2159_v41, 0.0 }
 0x26d   :  { %v2907_v8 = vpack.c.bf16 %v2208_v42, %v2208_v42 }
 0x26f   :  { %2455 = vst.msk [vmem:[%s4868_s3 + $0xc0] sm:$0xf] %vm2406_vm4, %v2907_v8 }

// kernel: lenet5_forward.4
= control target key start
LH: loop header
LB: loop body
LE: loop exit
PB: predicated region body
PF: predicated region fallthrough
CT: control target
= control target key end

     0   :  { %v796_v0 = vmov 0   ;;  %vm131_vm0 = vcmask 179200   ;;  %vm144_vm1 = vcmask 1042432   ;;  %vm634_vm2 = vcmask 125952   ;;  %s1104_s1 = inlined_call_operand.vmem [shape: bf16[150,16], index: 1, kind: input, shape index: {}]   ;;  %s1105_s0 = inlined_call_operand.vmem [shape: bf16[4,50,150], index: 0, kind: input, shape index: {}]   ;;  %s1106_s2 = inlined_call_operand.vmem [shape: f32[1,16], index: 2, kind: input, shape index: {}]   ;;  %s1107_s3 = inlined_call_operand.vmem [shape: bf16[50,16], index: 3, kind: output, shape index: {}]  }
   0x1   :  { %148 = vmatprep.subr.bf16.mxu0 %v796_v0  ;;  %265 = vmatprep.subr.bf16.mxu1 %v796_v0  ;;  %v822_v1 = vld [vmem:[%s1104_s1] sm:$0xff]   ;;  %v829_v2 = vld [vmem:[%s1104_s1 + $0x8] sm:$0xff]   ;;  %v838_v3 = vld [vmem:[%s1104_s1 + $0x10] sm:$0xff]   ;;  %vm641_vm3 = vcmask 122880  }
   0x2   :  { %149 = vmatpush1.bf16.msra.mxu0 %v822_v1  ;;  %266 = vmatpush1.bf16.msra.mxu1 %v822_v1  ;;  %v847_v4 = vld [vmem:[%s1104_s1 + $0x18] sm:$0xff]   ;;  %v754_v5 = vld [vmem:[%s1105_s0 + $0x4] ss:$8 sps:$4 sm:$0xff]   ;;  %v882_v9 = vld [vmem:[%s1104_s1 + $0x30] sm:$0xff]  }
   0x3   :  { %150 = vmatprep.subr.bf16.mxu0 %v796_v0  ;;  %267 = vmatprep.subr.bf16.mxu1 %v796_v0  ;;  %v757_v6 = vld [vmem:[%s1105_s0 + $0x3c] ss:$8 sps:$4 sm:$0xff]   ;;  %v873_v8 = vld [vmem:[%s1104_s1 + $0x28] sm:$0xff]   ;;  %v755_v15 = vld [vmem:[%s1105_s0 + $0x38] ss:$8 sps:$4 sm:$0xff]  }
   0x4   :  { %665 = vmatprep.mubr.msk.bf16.mxu0 %vm131_vm0, %v754_v5  ;;  %v863_v7 = vld [vmem:[%s1104_s1 + $0x20] sm:$0xff]   ;;  %684 = vmatprep.mubr.msk.bf16.mxu1 %vm131_vm0, %v757_v6  ;;  %v891_v10 = vld [vmem:[%s1104_s1 + $0x38] sm:$0xff]   ;;  %v751_v12 = vld [vmem:[%s1104_s1 + $0x48] ss:$0 sps:$4 sm:$0x77]  }
   0x5   :  { %v900_v11 = vld [vmem:[%s1104_s1 + $0x40] sm:$0xff]   ;;  %v911_v13 = vsel %vm144_vm1, %v751_v12, 0  ;;  %v758_v16 = vld [vmem:[%s1105_s0 + $0x14] ss:$8 sps:$4 sm:$0xff]   ;;  %v760_v18 = vld [vmem:[%s1105_s0 + $0x10] ss:$8 sps:$4 sm:$0xff]  }
   0x6   :  { %151 = vmatpush1.bf16.msra.mxu0 %v829_v2  ;;  %268 = vmatpush1.bf16.msra.mxu1 %v829_v2  ;;  %v752_v14 = vld [vmem:[%s1105_s0] ss:$8 sps:$4 sm:$0xff]   ;;  %v761_v17 = vld [vmem:[%s1105_s0 + $0x4c] ss:$8 sps:$4 sm:$0xff]   ;;  %v767_v21 = vld [vmem:[%s1105_s0 + $0x5c] ss:$8 sps:$4 sm:$0xff]  }
   0x7   :  { %152 = vmatprep.subr.bf16.mxu0 %v796_v0  ;;  %269 = vmatprep.subr.bf16.mxu1 %v796_v0  ;;  %v763_v19 = vld [vmem:[%s1105_s0 + $0x48] ss:$8 sps:$4 sm:$0xff]   ;;  %v764_v20 = vld [vmem:[%s1105_s0 + $0x24] ss:$8 sps:$4 sm:$0xff]   ;;  %v769_v23 = vld [vmem:[%s1105_s0 + $0x58] ss:$8 sps:$4 sm:$0xff]  }
   0x8   :  { %v766_v22 = vld [vmem:[%s1105_s0 + $0x20] ss:$8 sps:$4 sm:$0xff]   ;;  %v40_v24 = vld [vmem:[%s1105_s0 + $0x30] sm:$0x11]  ;;  %v780_v34 = vld [vmem:[%s1105_s0 + $0x84] ss:$8 sps:$4 sm:$0xff]  }
   0x9   :  { %v675_v25 = vld [vmem:[%s1105_s0 + $0x68] sm:$0x11]  ;;  %v654_v26 = vcombine.high %v40_v24, %v40_v24  ;;  %v653_v28 = vcombine.low %v40_v24, %v40_v24  ;;  %v776_v30 = vld [vmem:[%s1105_s0 + $0x74] ss:$8 sps:$4 sm:$0xff]   ;;  %v774_v32 = vld [vmem:[%s1105_s0 + $0x70] ss:$8 sps:$4 sm:$0xff]  }
   0xa   :  { %153 = vmatpush1.bf16.msra.mxu0 %v838_v3  ;;  %270 = vmatpush1.bf16.msra.mxu1 %v838_v3  ;;  %v683_v27 = vcombine.high %v675_v25, %v675_v25  ;;  %v682_v29 = vcombine.low %v675_v25, %v675_v25  ;;  %v779_v31 = vld [vmem:[%s1105_s0 + $0xac] ss:$8 sps:$4 sm:$0xff]   ;;  %v777_v33 = vld [vmem:[%s1105_s0 + $0xa8] ss:$8 sps:$4 sm:$0xff]   ;;  %v782_v35 = vld [vmem:[%s1105_s0 + $0xbc] ss:$8 sps:$4 sm:$0xff]  }
   0xb   :  { %154 = vmatprep.subr.bf16.mxu0 %v796_v0  ;;  %271 = vmatprep.subr.bf16.mxu1 %v796_v0  ;;  %v784_v36 = vld [vmem:[%s1105_s0 + $0x80] ss:$8 sps:$4 sm:$0xff]   ;;  %v786_v38 = vld [vmem:[%s1105_s0 + $0x94] ss:$8 sps:$4 sm:$0xff]   ;;  %v790_v42 = vld [vmem:[%s1105_s0 + $0x90] ss:$8 sps:$4 sm:$0xff]  }
   0xc   :  { %v785_v37 = vld [vmem:[%s1105_s0 + $0xb8] ss:$8 sps:$4 sm:$0xff]   ;;  %v788_v39 = vld [vmem:[%s1105_s0 + $0xcc] ss:$8 sps:$4 sm:$0xff]   ;;  %v791_v43 = vld [vmem:[%s1105_s0 + $0xc8] ss:$8 sps:$4 sm:$0xff]  }
   0xd   :  { %v694_v40 = vld [vmem:[%s1105_s0 + $0xa0] sm:$0x11]  ;;  %v713_v41 = vld [vmem:[%s1105_s0 + $0xd8] sm:$0x11] }
   0xe   :  { %155 = vmatpush1.bf16.msra.mxu0 %v847_v4  ;;  %272 = vmatpush1.bf16.msra.mxu1 %v847_v4  ;;  %v702_v44 = vcombine.high %v694_v40, %v694_v40  ;;  %v721_v45 = vcombine.high %v713_v41, %v713_v41  ;;  %v701_v46 = vcombine.low %v694_v40, %v694_v40 }
   0xf   :  { %156 = vmatprep.subr.bf16.mxu0 %v796_v0  ;;  %273 = vmatprep.subr.bf16.mxu1 %v796_v0  ;;  %v720_v47 = vcombine.low %v713_v41, %v713_v41 }
  0x12   :  { %157 = vmatpush1.bf16.msra.mxu0 %v863_v7  ;;  %274 = vmatpush1.bf16.msra.mxu1 %v863_v7 }
  0x13   :  { %158 = vmatprep.subr.bf16.mxu0 %v796_v0  ;;  %275 = vmatprep.subr.bf16.mxu1 %v796_v0 }
  0x16   :  { %159 = vmatpush1.bf16.msra.mxu0 %v873_v8  ;;  %276 = vmatpush1.bf16.msra.mxu1 %v873_v8 }
  0x17   :  { %160 = vmatprep.subr.bf16.mxu0 %v796_v0  ;;  %277 = vmatprep.subr.bf16.mxu1 %v796_v0 }
  0x1a   :  { %161 = vmatpush1.bf16.msra.mxu0 %v882_v9  ;;  %278 = vmatpush1.bf16.msra.mxu1 %v882_v9 }
  0x1b   :  { %162 = vmatprep.subr.bf16.mxu0 %v796_v0  ;;  %279 = vmatprep.subr.bf16.mxu1 %v796_v0 }
  0x1e   :  { %163 = vmatpush1.bf16.msra.mxu0 %v891_v10  ;;  %280 = vmatpush1.bf16.msra.mxu1 %v891_v10 }
  0x1f   :  { %164 = vmatprep.subr.bf16.mxu0 %v796_v0  ;;  %281 = vmatprep.subr.bf16.mxu1 %v796_v0 }
  0x22   :  { %165 = vmatpush1.bf16.msra.mxu0 %v900_v11  ;;  %282 = vmatpush1.bf16.msra.mxu1 %v900_v11 }
  0x23   :  { %166 = vmatprep.subr.bf16.mxu0 %v796_v0  ;;  %283 = vmatprep.subr.bf16.mxu1 %v796_v0 }
  0x26   :  { %167 = vmatpush1.bf16.msra.mxu0 %v911_v13  ;;  %284 = vmatpush1.bf16.msra.mxu1 %v911_v13 }
  0x27   :  { %389 = vmatprep.subr.bf16.mxu0 %v796_v0  ;;  %513 = vmatprep.subr.bf16.mxu1 %v796_v0 }
  0x29   :  { %181 = vmatmul.mubr.bf16.vlgmr.msra.gmra.mrb[0].mxu0 %v752_v14  ;;  %298 = vmatmul.mubr.bf16.vlgmr.msra.gmra.mrb[0].mxu1 %v755_v15 }
  0x2a   :  { %390 = vmatpush1.bf16.msra.mxu0 %v822_v1  ;;  %514 = vmatpush1.bf16.msra.mxu1 %v822_v1 }
  0x2b   :  { %391 = vmatprep.subr.bf16.mxu0 %v796_v0  ;;  %515 = vmatprep.subr.bf16.mxu1 %v796_v0 }
  0x2c   :  { %666 = vmatprep.mubr.msk.bf16.mxu0 %vm131_vm0, %v758_v16  ;;  %685 = vmatprep.mubr.msk.bf16.mxu1 %vm131_vm0, %v761_v17 }
  0x2e   :  { %392 = vmatpush1.bf16.msra.mxu0 %v829_v2  ;;  %516 = vmatpush1.bf16.msra.mxu1 %v829_v2 }
  0x2f   :  { %393 = vmatprep.subr.bf16.mxu0 %v796_v0  ;;  %517 = vmatprep.subr.bf16.mxu1 %v796_v0 }
  0x31   :  { %189 = vmatmul.mubr.bf16.gmra.mrb[4].mxu0 %v760_v18  ;;  %306 = vmatmul.mubr.bf16.gmra.mrb[4].mxu1 %v763_v19 }
  0x32   :  { %394 = vmatpush1.bf16.msra.mxu0 %v838_v3  ;;  %518 = vmatpush1.bf16.msra.mxu1 %v838_v3 }
  0x33   :  { %395 = vmatprep.subr.bf16.mxu0 %v796_v0  ;;  %519 = vmatprep.subr.bf16.mxu1 %v796_v0 }
  0x34   :  { %667 = vmatprep.mubr.msk.bf16.mxu0 %vm131_vm0, %v764_v20  ;;  %686 = vmatprep.mubr.msk.bf16.mxu1 %vm131_vm0, %v767_v21 }
  0x36   :  { %396 = vmatpush1.bf16.msra.mxu0 %v847_v4  ;;  %520 = vmatpush1.bf16.msra.mxu1 %v847_v4 }
  0x37   :  { %397 = vmatprep.subr.bf16.mxu0 %v796_v0  ;;  %521 = vmatprep.subr.bf16.mxu1 %v796_v0 }
  0x39   :  { %197 = vmatmul.mubr.bf16.gmra.mrb[8].mxu0 %v766_v22  ;;  %314 = vmatmul.mubr.bf16.gmra.mrb[8].mxu1 %v769_v23 }
  0x3a   :  { %398 = vmatpush1.bf16.msra.mxu0 %v863_v7  ;;  %522 = vmatpush1.bf16.msra.mxu1 %v863_v7 }
  0x3b   :  { %399 = vmatprep.subr.bf16.mxu0 %v796_v0  ;;  %523 = vmatprep.subr.bf16.mxu1 %v796_v0 }
  0x3c   :  { %668 = vmatprep.mubr.msk.bf16.mxu0 %vm131_vm0, %v654_v26  ;;  %687 = vmatprep.mubr.msk.bf16.mxu1 %vm131_vm0, %v683_v27 }
  0x3e   :  { %400 = vmatpush1.bf16.msra.mxu0 %v873_v8  ;;  %524 = vmatpush1.bf16.msra.mxu1 %v873_v8 }
  0x3f   :  { %401 = vmatprep.subr.bf16.mxu0 %v796_v0  ;;  %525 = vmatprep.subr.bf16.mxu1 %v796_v0 }
  0x41   :  { %205 = vmatmul.mubr.bf16.gmra.mrb[12].mxu0 %v653_v28  ;;  %322 = vmatmul.mubr.bf16.gmra.mrb[12].mxu1 %v682_v29  ;;  %v1065_v28 = vld [vmem:[%s1106_s2] ss:$0 sm:$0xff] }
  0x42   :  { %402 = vmatpush1.bf16.msra.mxu0 %v882_v9  ;;  %526 = vmatpush1.bf16.msra.mxu1 %v882_v9 }
  0x43   :  { %403 = vmatprep.subr.bf16.mxu0 %v796_v0  ;;  %527 = vmatprep.subr.bf16.mxu1 %v796_v0 }
  0x44   :  { %703 = vmatprep.mubr.msk.bf16.mxu0 %vm131_vm0, %v776_v30  ;;  %722 = vmatprep.mubr.msk.bf16.mxu1 %vm131_vm0, %v779_v31 }
  0x46   :  { %404 = vmatpush1.bf16.msra.mxu0 %v891_v10  ;;  %528 = vmatpush1.bf16.msra.mxu1 %v891_v10 }
  0x47   :  { %405 = vmatprep.subr.bf16.mxu0 %v796_v0  ;;  %529 = vmatprep.subr.bf16.mxu1 %v796_v0 }
  0x4a   :  { %406 = vmatpush1.bf16.msra.mxu0 %v900_v11  ;;  %530 = vmatpush1.bf16.msra.mxu1 %v900_v11 }
  0x4b   :  { %407 = vmatprep.subr.bf16.mxu0 %v796_v0  ;;  %531 = vmatprep.subr.bf16.mxu1 %v796_v0 }
  0x4e   :  { %408 = vmatpush1.bf16.msra.mxu0 %v911_v13  ;;  %532 = vmatpush1.bf16.msra.mxu1 %v911_v13 }
  0x51   :  { %422 = vmatmul.mubr.bf16.vlgmr.msra.gmra.mrb[16].mxu0 %v774_v32  ;;  %546 = vmatmul.mubr.bf16.vlgmr.msra.gmra.mrb[16].mxu1 %v777_v33 }
  0x52   :  { %704 = vmatprep.mubr.msk.bf16.mxu0 %vm131_vm0, %v780_v34  ;;  %723 = vmatprep.mubr.msk.bf16.mxu1 %vm131_vm0, %v782_v35 }
  0x59   :  { %430 = vmatmul.mubr.bf16.gmra.mrb[20].mxu0 %v784_v36  ;;  %554 = vmatmul.mubr.bf16.gmra.mrb[20].mxu1 %v785_v37 }
  0x5a   :  { %705 = vmatprep.mubr.msk.bf16.mxu0 %vm131_vm0, %v786_v38  ;;  %724 = vmatprep.mubr.msk.bf16.mxu1 %vm131_vm0, %v788_v39 }
  0x61   :  { %438 = vmatmul.mubr.bf16.gmra.mrb[24].mxu0 %v790_v42  ;;  %562 = vmatmul.mubr.bf16.gmra.mrb[24].mxu1 %v791_v43 }
  0x62   :  { %706 = vmatprep.mubr.msk.bf16.mxu0 %vm131_vm0, %v702_v44  ;;  %725 = vmatprep.mubr.msk.bf16.mxu1 %vm131_vm0, %v721_v45 }
  0x69   :  { %446 = vmatmul.mubr.bf16.gmra.mrb[28].mxu0 %v701_v46  ;;  %570 = vmatmul.mubr.bf16.gmra.mrb[28].mxu1 %v720_v47 }
  0xfc   :  { %v182_v48 = vpop.f32.mrb[0].mxu0  ;;  %v299_v49 = vpop.f32.mrb[0].mxu1 }
  0xfd   :  { %v329_v50 = vmax.f32 %v182_v48, %v299_v49  ;;  %v184_v51 = vpop.f32.mrb[1].mxu0  ;;  %v301_v52 = vpop.f32.mrb[1].mxu1 }
  0xfe   :  { %v185_v53 = vpop.f32.mrb[2].mxu0  ;;  %v302_v54 = vpop.f32.mrb[2].mxu1 }
  0xff   :  { %v330_v55 = vmax.f32 %v185_v53, %v302_v54  ;;  %v187_v56 = vpop.f32.mrb[3].mxu0  ;;  %v304_v57 = vpop.f32.mrb[3].mxu1 }
 0x104   :  { %v190_v58 = vpop.f32.mrb[4].mxu0  ;;  %v307_v59 = vpop.f32.mrb[4].mxu1 }
 0x105   :  { %v192_v60 = vpop.f32.mrb[5].mxu0  ;;  %v331_v61 = vmax.f32 %v190_v58, %v307_v59  ;;  %v309_v62 = vpop.f32.mrb[5].mxu1 }
 0x106   :  { %v193_v63 = vpop.f32.mrb[6].mxu0  ;;  %v310_v0 = vpop.f32.mrb[6].mxu1 }
 0x107   :  { %v195_v1 = vpop.f32.mrb[7].mxu0  ;;  %v332_v2 = vmax.f32 %v193_v63, %v310_v0  ;;  %v312_v3 = vpop.f32.mrb[7].mxu1 }
 0x10c   :  { %v1047_v4 = vpop.f32.mrb[8].mxu0  ;;  %v315_v5 = vpop.f32.mrb[8].mxu1 }
 0x10d   :  { %v200_v6 = vpop.f32.mrb[9].mxu0  ;;  %v333_v7 = vmax.f32 %v1047_v4, %v315_v5  ;;  %v317_v8 = vpop.f32.mrb[9].mxu1 }
 0x10e   :  { %v1050_v9 = vpop.f32.mrb[10].mxu0  ;;  %v1052_v10 = vpop.f32.mrb[10].mxu1 }
 0x10f   :  { %v203_v11 = vpop.f32.mrb[11].mxu0  ;;  %v334_v12 = vmax.f32 %v1050_v9, %v1052_v10  ;;  %v320_v13 = vpop.f32.mrb[11].mxu1 }
 0x114   :  { %v1056_v14 = vpop.f32.mrb[12].mxu0  ;;  %v1058_v15 = vpop.f32.mrb[12].mxu1 }
 0x115   :  { %v208_v16 = vpop.f32.mrb[13].mxu0  ;;  %v335_v17 = vmax.f32 %v1056_v14, %v1058_v15  ;;  %v325_v18 = vpop.f32.mrb[13].mxu1 }
 0x116   :  { %v209_v19 = vpop.f32.mrb[14].mxu0  ;;  %v326_v20 = vpop.f32.mrb[14].mxu1 }
 0x117   :  { %v210_v21 = vpop.f32.mrb[15].mxu0  ;;  %v327_v22 = vpop.f32.mrb[15].mxu1 }
 0x124   :  { %v423_v23 = vpop.f32.mrb[16].mxu0  ;;  %v547_v24 = vpop.f32.mrb[16].mxu1 }
 0x125   :  { %v453_v25 = vmax.f32 %v329_v50, %v423_v23  ;;  %v425_v26 = vpop.f32.mrb[17].mxu0  ;;  %v549_v27 = vpop.f32.mrb[17].mxu1 }
 0x126   :  { %v426_v29 = vpop.f32.mrb[18].mxu0  ;;  %v550_v30 = vpop.f32.mrb[18].mxu1 }
 0x127   :  { %v577_v31 = vmax.f32 %v453_v25, %v547_v24  ;;  %v454_v32 = vmax.f32 %v330_v55, %v426_v29  ;;  %v428_v33 = vpop.f32.mrb[19].mxu0  ;;  %v552_v34 = vpop.f32.mrb[19].mxu1 }
 0x129   :  { %v591_v35 = vadd.f32 %v1065_v28, %v577_v31  ;;  %v578_v36 = vmax.f32 %v454_v32, %v550_v30 }
 0x12b   :  { %v598_v37 = vmax.f32 %v591_v35, 0.0  ;;  %v592_v38 = vadd.f32 %v1065_v28, %v578_v36 }
 0x12c   :  { %v431_v39 = vpop.f32.mrb[20].mxu0  ;;  %v555_v40 = vpop.f32.mrb[20].mxu1 }
 0x12d   :  { %v734_v41 = vpack.c.bf16 %v598_v37, %v598_v37  ;;  %v599_v42 = vmax.f32 %v592_v38, 0.0  ;;  %v455_v43 = vmax.f32 %v331_v61, %v431_v39  ;;  %v433_v44 = vpop.f32.mrb[21].mxu0  ;;  %v557_v45 = vpop.f32.mrb[21].mxu1 }
 0x12e   :  { %v434_v46 = vpop.f32.mrb[22].mxu0  ;;  %v558_v47 = vpop.f32.mrb[22].mxu1 }
 0x12f   :  { %635 = vst.msk [vmem:[%s1107_s3] sm:$0xf] %vm634_vm2, %v734_v41  ;;  %v735_v48 = vpack.c.bf16 %v599_v42, %v599_v42  ;;  %v579_v49 = vmax.f32 %v455_v43, %v555_v40  ;;  %v456_v50 = vmax.f32 %v332_v2, %v434_v46  ;;  %v436_v51 = vpop.f32.mrb[23].mxu0  ;;  %v560_v52 = vpop.f32.mrb[23].mxu1 }
 0x131   :  { %636 = vst.msk [vmem:[%s1107_s3 + $0x4] sm:$0xf] %vm634_vm2, %v735_v48  ;;  %v593_v53 = vadd.f32 %v1065_v28, %v579_v49  ;;  %v580_v54 = vmax.f32 %v456_v50, %v558_v47 }
 0x133   :  { %v600_v55 = vmax.f32 %v593_v53, 0.0  ;;  %v594_v56 = vadd.f32 %v1065_v28, %v580_v54 }
 0x134   :  { %v439_v57 = vpop.f32.mrb[24].mxu0  ;;  %v563_v58 = vpop.f32.mrb[24].mxu1 }
 0x135   :  { %v736_v59 = vpack.c.bf16 %v600_v55, %v600_v55  ;;  %v601_v60 = vmax.f32 %v594_v56, 0.0  ;;  %v457_v61 = vmax.f32 %v333_v7, %v439_v57  ;;  %v441_v62 = vpop.f32.mrb[25].mxu0  ;;  %v565_v63 = vpop.f32.mrb[25].mxu1 }
 0x136   :  { %v442_v0 = vpop.f32.mrb[26].mxu0  ;;  %v566_v1 = vpop.f32.mrb[26].mxu1 }
 0x137   :  { %637 = vst.msk [vmem:[%s1107_s3 + $0x8] sm:$0xf] %vm634_vm2, %v736_v59  ;;  %v737_v2 = vpack.c.bf16 %v601_v60, %v601_v60  ;;  %v581_v3 = vmax.f32 %v457_v61, %v563_v58  ;;  %v458_v4 = vmax.f32 %v334_v12, %v442_v0  ;;  %v444_v5 = vpop.f32.mrb[27].mxu0  ;;  %v568_v6 = vpop.f32.mrb[27].mxu1 }
 0x139   :  { %638 = vst.msk [vmem:[%s1107_s3 + $0xc] sm:$0xf] %vm634_vm2, %v737_v2  ;;  %v595_v7 = vadd.f32 %v1065_v28, %v581_v3  ;;  %v582_v8 = vmax.f32 %v458_v4, %v566_v1 }
 0x13b   :  { %v602_v9 = vmax.f32 %v595_v7, 0.0  ;;  %v596_v10 = vadd.f32 %v1065_v28, %v582_v8 }
 0x13c   :  { %v447_v11 = vpop.f32.mrb[28].mxu0  ;;  %v571_v13 = vpop.f32.mrb[28].mxu1 }
 0x13d   :  { %v738_v16 = vpack.c.bf16 %v602_v9, %v602_v9  ;;  %v603_v18 = vmax.f32 %v596_v10, 0.0  ;;  %v459_v12 = vmax.f32 %v335_v17, %v447_v11  ;;  %v449_v19 = vpop.f32.mrb[29].mxu0  ;;  %v573_v20 = vpop.f32.mrb[29].mxu1 }
 0x13e   :  { %v450_v21 = vpop.f32.mrb[30].mxu0  ;;  %v574_v22 = vpop.f32.mrb[30].mxu1 }
 0x13f   :  { %639 = vst.msk [vmem:[%s1107_s3 + $0x10] sm:$0xf] %vm634_vm2, %v738_v16  ;;  %v739_v23 = vpack.c.bf16 %v603_v18, %v603_v18  ;;  %v583_v24 = vmax.f32 %v459_v12, %v571_v13  ;;  %v451_v25 = vpop.f32.mrb[31].mxu0  ;;  %v575_v26 = vpop.f32.mrb[31].mxu1 }
 0x141   :  { %640 = vst.msk [vmem:[%s1107_s3 + $0x14] sm:$0xf] %vm634_vm2, %v739_v23  ;;  %v597_v14 = vadd.f32 %v1065_v28, %v583_v24 }
 0x143   :  { %v604_v15 = vmax.f32 %v597_v14, 0.0 }
 0x145   :  { %v740_v17 = vpack.c.bf16 %v604_v15, %v604_v15 }
 0x147   :  { %642 = vst.msk [vmem:[%s1107_s3 + $0x18] sm:$0x1] %vm641_vm3, %v740_v17 }

// kernel: lenet5_forward.5
= control target key start
LH: loop header
LB: loop body
LE: loop exit
PB: predicated region body
PF: predicated region fallthrough
CT: control target
= control target key end

     0   :  { %v770_v1 = vmov 0   ;;  %v98_v20 = vlaneseq  ;;  %v771_v25 = vmov 1966171168   ;;  %vm264_vm0 = vcmask 130048   ;;  %s981_s0 = inlined_call_operand.vmem [shape: bf16[2,400], index: 0, kind: input, shape index: {}]   ;;  %s982_s1 = inlined_call_operand.vmem [shape: bf16[400,120], index: 1, kind: input, shape index: {}]   ;;  %s983_s2 = inlined_call_operand.vmem [shape: f32[1,120], index: 2, kind: input, shape index: {}]   ;;  %s984_s3 = inlined_call_operand.vmem [shape: bf16[120,84], index: 3, kind: input, shape index: {}]   ;;  %s985_s4 = inlined_call_operand.vmem [shape: f32[1,84], index: 4, kind: input, shape index: {}]   ;;  %s986_s5 = inlined_call_operand.vmem [shape: bf16[84,10], index: 5, kind: input, shape index: {}]   ;;  %s987_s6 = inlined_call_operand.vmem [shape: f32[1,10], index: 6, kind: input, shape index: {}]   ;;  %s988_s7 = inlined_call_operand.hbm [shape: f32[2,10], index: 7, kind: output, shape index: {}]  }
   0x1   :  { %v707_v0 = vld [vmem:[%s982_s1 + $0x40] sm:$0xff]   ;;  %308 = vmatprep.subr.bf16.mxu1 %v770_v1  ;;  %v710_v4 = vld [vmem:[%s982_s1 + $0x48] sm:$0xff]   ;;  %v713_v7 = vld [vmem:[%s982_s1 + $0x50] sm:$0xff]   ;;  %v96_v26 = vunpack.c.l.s4 %v771_v25  ;;  %v772_v38 = vmov 0.0  }
   0x2   :  { %v708_v2 = vld [vmem:[%s982_s1 + $0x80] sm:$0xff]   ;;  %628 = vmatprep.subr.bf16.mxu0 %v707_v0  ;;  %v711_v5 = vld [vmem:[%s982_s1 + $0x88] sm:$0xff]   ;;  %v714_v8 = vld [vmem:[%s982_s1 + $0x90] sm:$0xff]   ;;  %v99_v27 = vshrl.u32 %v98_v20, 7 }
   0x3   :  { %v709_v3 = vld [vmem:[%s982_s1] sm:$0xff]   ;;  %309 = vmatpush1.bf16.msra.mxu1 %v708_v2  ;;  %v712_v6 = vld [vmem:[%s982_s1 + $0x8] sm:$0xff]   ;;  %v715_v9 = vld [vmem:[%s982_s1 + $0x10] sm:$0xff]   ;;  %v97_v30 = vunpack.c.0.s8 %v96_v26 }
   0x4   :  { %629 = vmatpush3.bf16.msra.mxu0 %v709_v3  ;;  %310 = vmatprep.subr.bf16.mxu1 %v770_v1  ;;  %v716_v10 = vld [vmem:[%s982_s1 + $0x58] sm:$0xff]   ;;  %v719_v13 = vld [vmem:[%s982_s1 + $0x60] sm:$0xff]   ;;  %v722_v16 = vld [vmem:[%s982_s1 + $0x68] sm:$0xff]  }
   0x5   :  { %630 = vmatprep.subr.bf16.mxu0 %v710_v4  ;;  %v717_v11 = vld [vmem:[%s982_s1 + $0x98] sm:$0xff]   ;;  %v720_v14 = vld [vmem:[%s982_s1 + $0xa0] sm:$0xff]   ;;  %v723_v17 = vld [vmem:[%s982_s1 + $0xa8] sm:$0xff]   ;;  %v100_v32 = vsub.s32 %v97_v30, %v99_v27 }
   0x6   :  { %v718_v12 = vld [vmem:[%s982_s1 + $0x18] sm:$0xff]   ;;  %v721_v15 = vld [vmem:[%s982_s1 + $0x20] sm:$0xff]   ;;  %v724_v18 = vld [vmem:[%s982_s1 + $0x28] sm:$0xff]  }
   0x7   :  { %311 = vmatpush1.bf16.msra.mxu1 %v711_v5  ;;  %v725_v19 = vld [vmem:[%s982_s1 + $0x70] sm:$0xff]   ;;  %v583_v23 = vld.sshfl [vmem:[%s981_s0] sm:$0x33 pattern:$0x75316420]  ;;  %v728_v24 = vld [vmem:[%s982_s1 + $0x78] sm:$0xff]  }
   0x8   :  { %631 = vmatpush3.bf16.msra.mxu0 %v712_v6  ;;  %312 = vmatprep.subr.bf16.mxu1 %v770_v1  ;;  %v726_v21 = vld [vmem:[%s982_s1 + $0xb0] sm:$0xff]   ;;  %v729_v28 = vld [vmem:[%s982_s1 + $0xb8] sm:$0xff]   ;;  %v94_v29 = vcombine.high %v583_v23, %v583_v23  ;;  %v731_v33 = vld [vmem:[%s982_s1 + $0xc0] sm:$0xff]   ;;  %v101_v36 = vrot.slane %v583_v23, %v100_v32 }
   0x9   :  { %632 = vmatprep.subr.bf16.mxu0 %v713_v7  ;;  %v727_v22 = vld [vmem:[%s982_s1 + $0x30] sm:$0xff]   ;;  %v730_v31 = vld [vmem:[%s982_s1 + $0x38] sm:$0xff]   ;;  %v732_v34 = vld [vmem:[%s984_s3] sm:$0xff]  }
   0xa   :  { %v108_v35 = vrot.slane %v94_v29, %v100_v32  ;;  %v109_v39 = vcombine.high %v101_v36, %v101_v36  ;;  %v733_v40 = vld [vmem:[%s984_s3 + $0x8] sm:$0xff]  }
   0xb   :  { %313 = vmatpush1.bf16.msra.mxu1 %v714_v8 }
   0xc   :  { %633 = vmatpush3.bf16.msra.mxu0 %v715_v9  ;;  %314 = vmatprep.subr.bf16.mxu1 %v770_v1  ;;  %v110_v37 = vcombine.high %v108_v35, %v108_v35 }
   0xd   :  { %634 = vmatprep.subr.bf16.mxu0 %v716_v10  ;;  %300 = vmatprep.mubr.bf16.mxu0 %v108_v35 }
   0xe   :  { %609 = vmatprep.mubr.msk.bf16.mxu1 %vm264_vm0, %v110_v37 }
   0xf   :  { %315 = vmatpush1.bf16.msra.mxu1 %v717_v11 }
  0x10   :  { %635 = vmatpush3.bf16.msra.mxu0 %v718_v12  ;;  %316 = vmatprep.subr.bf16.mxu1 %v770_v1 }
  0x11   :  { %636 = vmatprep.subr.bf16.mxu0 %v719_v13 }
  0x13   :  { %317 = vmatpush1.bf16.msra.mxu1 %v720_v14 }
  0x14   :  { %637 = vmatpush3.bf16.msra.mxu0 %v721_v15  ;;  %318 = vmatprep.subr.bf16.mxu1 %v770_v1 }
  0x15   :  { %638 = vmatprep.subr.bf16.mxu0 %v722_v16 }
  0x17   :  { %319 = vmatpush1.bf16.msra.mxu1 %v723_v17 }
  0x18   :  { %639 = vmatpush3.bf16.msra.mxu0 %v724_v18  ;;  %320 = vmatprep.subr.bf16.mxu1 %v770_v1 }
  0x19   :  { %640 = vmatprep.subr.bf16.mxu0 %v725_v19 }
  0x1b   :  { %321 = vmatpush1.bf16.msra.mxu1 %v726_v21 }
  0x1c   :  { %641 = vmatpush3.bf16.msra.mxu0 %v727_v22  ;;  %322 = vmatprep.subr.bf16.mxu1 %v770_v1 }
  0x1d   :  { %642 = vmatprep.subr.bf16.mxu0 %v728_v24 }
  0x1f   :  { %323 = vmatpush1.bf16.msra.mxu1 %v729_v28 }
  0x20   :  { %643 = vmatpush3.bf16.msra.mxu0 %v730_v31  ;;  %324 = vmatprep.subr.bf16.mxu1 %v770_v1 }
  0x21   :  { %666 = vmatprep.subr.bf16.mxu0 %v772_v38 }
  0x23   :  { %301 = vmatmul.mubr.bf16.vlgmr.msra.gmra.mrb[0].mxu0 %v101_v36  ;;  %325 = vmatpush1.bf16.msra.mxu1 %v731_v33 }
  0x24   :  { %667 = vmatpush3.bf16.msra.mxu0 %v732_v34 }
  0x25   :  { %12 = vsyncpa [#allocation3], 0  ;;  %668 = vmatprep.subr.bf16.mxu0 %v772_v38  ;;  %686 = vmatprep.subr.bf16.mxu1 %v772_v38  ;;  %v734_v41 = vld [vmem:[%s984_s3 + $0x10] sm:$0xff]   ;;  %v735_v42 = vld [vmem:[%s984_s3 + $0x18] sm:$0xff]   ;;  %vm421_vm1 = vcmask 1043456   ;;  %vm773_vm2 = vmmov 0  }
  0x26   :  { %341 = vmatmul.mubr.bf16.vlgmr.msra.gmra.mrb[0].mxu1 %v109_v39  ;;  %v736_v43 = vld [vmem:[%s984_s3 + $0x20] sm:$0xff]   ;;  %v737_v44 = vld [vmem:[%s984_s3 + $0x28] sm:$0xff]   ;;  %v738_v45 = vld [vmem:[%s984_s3 + $0x30] sm:$0xff]   ;;  %682 = vmatprep.mubr.msk.bf16.mxu0 %vm773_vm2, %v772_v38  ;;  %vm417_vm3 = vcmask 982016   ;;  %vm522_vm4 = vcmask 1041408   ;;  %vm518_vm5 = vcmask 687104  }
  0x27   :  { %v739_v46 = vld [vmem:[%s984_s3 + $0x38] ss:$0 sps:$4 sm:$0xff]   ;;  %698 = vmatprep.mubr.msk.bf16.mxu1 %vm773_vm2, %v772_v38  ;;  %v740_v48 = vld [vmem:[%s986_s5] sm:$0xff]   ;;  %v741_v49 = vld [vmem:[%s986_s5 + $0x8] sm:$0xff]   ;;  %vm566_vm6 = vcmask 74752  }
  0x28   :  { %669 = vmatpush3.bf16.msra.mxu0 %v733_v40  ;;  %v423_v47 = vsel %vm421_vm1, %v739_v46, 0  ;;  %687 = vmatpush3.bf16.msra.mxu1 %v740_v48  ;;  %v742_v50 = vld [vmem:[%s986_s5 + $0x10] sm:$0xff]   ;;  %v743_v51 = vld [vmem:[%s986_s5 + $0x18] sm:$0xff]   ;;  %v582_v54 = vld [vmem:[%s983_s2] ss:$0 sm:$0xff] }
  0x29   :  { %670 = vmatprep.subr.bf16.mxu0 %v772_v38  ;;  %688 = vmatprep.subr.bf16.mxu1 %v772_v38  ;;  %v744_v2 = vld [vmem:[%s986_s5 + $0x20] sm:$0xff]   ;;  %v745_v3 = vld [vmem:[%s986_s5 + $0x28] ss:$0 sps:$4 sm:$0x33]   ;;  %s774_s5 = smov [#allocation2]  }
  0x2a   :  { %v524_v4 = vsel %vm522_vm4, %v745_v3, 0  ;;  %v610_v5 = vld [vmem:[%s985_s4] ss:$0 sm:$0xff]  ;;  %s574_s12 = sshll.u32 %s774_s5, 4  ;;  %s575_s12 = int_to_ptr.vmem [resolvable:$true] %s574_s12 }
  0x2b   :  { %v620_v13 = vld [vmem:[%s987_s6] ss:$0 sm:$0xff]  ;;  %s746_s4 = scalar_lea.vmem %s575_s12, 32  ;;  %p751_p1 = scmp.lt.s32.totalorder %s575_s12, %s575_s12 }
  0x2c   :  { %671 = vmatpush3.bf16.msra.mxu0 %v734_v41  ;;  %689 = vmatpush3.bf16.msra.mxu1 %v741_v49  ;;  %p747_p0 = scmp.ne.s32.totalorder %s575_s12, %s746_s4  ;;  %p752_p2 = scmp.lt.s32.totalorder %s746_s4, %s746_s4 }
  0x2d   :  { %672 = vmatprep.subr.bf16.mxu0 %v772_v38  ;;  %690 = vmatprep.subr.bf16.mxu1 %v772_v38 }
  0x2e   :  { %p753_p3 = por %p752_p2, %p751_p1 }
  0x30   :  { %673 = vmatpush3.bf16.msra.mxu0 %v735_v42  ;;  %691 = vmatpush3.bf16.msra.mxu1 %v742_v50  ;;  %p754_p4 = pnand %p753_p3, %p747_p0 }
  0x31   :  { %674 = vmatprep.subr.bf16.mxu0 %v772_v38  ;;  %692 = vmatprep.subr.bf16.mxu1 %v772_v38 }
  0x34   :  { %675 = vmatpush3.bf16.msra.mxu0 %v736_v43  ;;  %693 = vmatpush3.bf16.msra.mxu1 %v743_v51 }
  0x35   :  { %676 = vmatprep.subr.bf16.mxu0 %v772_v38  ;;  %694 = vmatprep.subr.bf16.mxu1 %v772_v38 }
  0x38   :  { %677 = vmatpush3.bf16.msra.mxu0 %v737_v44  ;;  %695 = vmatpush3.bf16.msra.mxu1 %v744_v2 }
  0x39   :  { %678 = vmatprep.subr.bf16.mxu0 %v772_v38  ;;  %696 = vmatprep.subr.bf16.mxu1 %v772_v38 }
  0x3c   :  { %679 = vmatpush3.bf16.msra.mxu0 %v738_v45  ;;  %697 = vmatpush3.bf16.msra.mxu1 %v524_v4 }
  0x3d   :  { %680 = vmatprep.subr.bf16.mxu0 %v772_v38 }
  0x40   :  { %681 = vmatpush3.bf16.msra.mxu0 %v423_v47 }
  0xf6   :  { %v644_v52 = vpop.f32.mrb[0].mxu0 }
  0xf7   :  { %v645_v53 = vpop.f32.mrb[1].mxu0 }
  0xf8   :  { %v646_v55 = vadd.f32 %v645_v53, %v644_v52  ;;  %v647_v56 = vpop.f32.mrb[2].mxu0 }
  0xf9   :  { %v648_v57 = vpop.f32.mrb[3].mxu0  ;;  %v342_v58 = vpop.f32.mrb[0].mxu1 }
  0xfa   :  { %v303_v59 = vadd.f32 %v646_v55, %v582_v54  ;;  %v344_v60 = vpop.f32.mrb[1].mxu1 }
  0xfb   :  { %v345_v61 = vpop.f32.mrb[2].mxu1 }
  0xfc   :  { %v343_v62 = vadd.f32 %v342_v58, %v303_v59  ;;  %v346_v63 = vpop.f32.mrb[3].mxu1 }
  0xfe   :  { %v348_v0 = vmax.f32 %v343_v62, 0.0 }
 0x100   :  { %v349_v1 = vpack.c.bf16 %v348_v0, %v348_v0 }
 0x102   :  { %683 = vmatmul.mubr.msk.bf16.vlgmr.msra.gmra.mrb[4].mxu0 %vm417_vm3, %v349_v1 }
 0x1d5   :  { %v459_v6 = vpop.f32.mrb[4].mxu0 }
 0x1d6   :  { %v460_v7 = vadd.f32 %v610_v5, %v459_v6  ;;  %v684_v8 = vpop.f32.mrb[5].mxu0 }
 0x1d7   :  { %v462_v9 = vpop.f32.mrb[6].mxu0 }
 0x1d8   :  { %v465_v10 = vmax.f32 %v460_v7, 0.0  ;;  %v685_v11 = vpop.f32.mrb[7].mxu0 }
 0x1da   :  { %v466_v12 = vpack.c.bf16 %v465_v10, %v465_v10 }
 0x1dc   :  { %699 = vmatmul.mubr.msk.bf16.vlgmr.msra.gmra.mrb[4].mxu1 %vm518_vm5, %v466_v12 }
 0x2af   :  { %v560_v14 = vpop.f32.mrb[4].mxu1 }
 0x2b0   :  { %v561_v15 = vadd.f32 %v620_v13, %v560_v14  ;;  %v700_v16 = vpop.f32.mrb[5].mxu1 }
 0x2b1   :  { %v563_v17 = vpop.f32.mrb[6].mxu1 }
 0x2b2   :  { %v701_v18 = vpop.f32.mrb[7].mxu1  ;;  %567 = vst.msk [vmem:[#allocation2] sm:$0x3] %vm566_vm6, %v561_v15 }
 0x2b3   :  { %757 = shalt.err (!%p754_p4)
}
 0x2b4   :  { %s758_s6 = scalar_lea.hbm %s988_s7, 32 }
 0x2b5   :  { %p759_p5 = scmp.ne.s32.totalorder %s988_s7, %s758_s6  ;;  %p762_p6 = scmp.lt.u32.totalorder %s758_s6, %s988_s7 }
 0x2b7   :  { %p764_p7 = pnand %p762_p6, %p759_p5 }
 0x2b9   :  { %767 = shalt.err (!%p764_p7)
}
 0x2ba   :  { %577 = dma.vmem_to_hbm [thread:$0]  %s575_s12, 32, %s988_s7, [#allocation3]  }
 0x2bb   :  { %768 = dma.done.wait [#allocation3], 32  }
 0x2bc   :  { %769 = vsyncadd [#allocation3], 4294967264 }
 0x2bd   :  { %581 = vsyncpa [#allocation3], 1 }

</bundles_post_ra>
